<compile_context>
chip_gen: v7x
topology: tpu7x:2x2x1
jax: 0.10.0
libtpu: 0.0.40
codegen_flags: <defaults>
</compile_context>

<pallas_src>
import functools
import math

import jax
import jax.numpy as jnp
from jax.experimental import pallas as pl
from jax.experimental.pallas import tpu as pltpu


_LN_EPS = 1e-5
_REVIN_EPS = 1e-5
_INV_SQRT2 = 0.7071067811865476
_NEG_BIG = 1e30

# ---- packed bias / LayerNorm vector table layout (shared by wrapper & kernel) ----
(R_RW, R_PG1, R_PB1, R_PBW, R_PG2, R_PB2, R_GF, R_BF, R_BH1, R_BB) = range(10)
N_FIXED = 10
(L_BQKV, L_BO, L_G1, L_B1, L_BF1, L_BF2, L_G2, L_B2) = range(8)
PER_LAYER = 8


def _round_up(n, m):
    return ((n + m - 1) // m) * m


# ------------------------------ in-kernel helpers ------------------------------ #

def _layernorm(x, g, b, eps=_LN_EPS):
    mu = jnp.mean(x, axis=-1, keepdims=True)
    var = jnp.mean((x - mu) ** 2, axis=-1, keepdims=True)
    return (x - mu) * jax.lax.rsqrt(var + eps) * g + b


def _softmax(x):
    m = jnp.max(x, axis=-1, keepdims=True)
    e = jnp.exp(x - m)
    return e / jnp.sum(e, axis=-1, keepdims=True)      # exact divide (tight numerics)


def _erf(x):
    # Abramowitz & Stegun 7.1.26 (max abs error 1.5e-7).  Uses only ops guaranteed to
    # lower in Mosaic (abs / div / mul / add / exp / where) -> no dependence on a
    # native erf lowering.
    ax = jnp.abs(x)
    t = 1.0 / (1.0 + 0.3275911 * ax)
    poly = ((((1.061405429 * t - 1.453152027) * t + 1.421413741) * t
             - 0.284496736) * t + 0.254829592) * t
    y = 1.0 - poly * jnp.exp(-ax * ax)
    return jnp.where(x < 0.0, -y, y)


def _gelu(x):
    # exact erf-GELU (PyTorch nn.GELU() default), accurate to ~1.5e-7
    return 0.5 * x * (1.0 + _erf(x * _INV_SQRT2))


# -------------------------------- fused kernel --------------------------------- #

def fused_forward_kernel(
    # activations (batch folded into rows: row r = b*L + l)
    x_ref,          # (R, PC)   input in patch layout
    # RevIN / positional-embedding helpers
    cavg_ref,       # (PC, PC)  same-channel column-averaging matrix (1/P)
    bavg_ref,       # (R, R)    same-batch row-averaging matrix      (1/L)
    perb_ref,       # (R, PC)   positional embedding + RevIN affine bias
    # packed small vectors (biases / LayerNorm gamma & beta), static row slices
    vec_ref,        # (NV, VW)
    # weights (constant block index -> DMA'd once, VMEM resident)
    pw_ref,         # (PC, D)        patch-embedding linear
    wqkv_ref,       # (NL, D, QW)    fused [Wq|Wk|Wv], lane-padded
    wo_ref,         # (NL, D, D)     attention out-projection
    w1_ref,         # (NL, D, DFF)   FFN up
    w2_ref,         # (NL, DFF, D)   FFN down
    wh1_ref,        # (D, H1W)       fused [projection | projection2[0]], lane-padded
    wb_ref,         # (D, PP)        projection2[2]
    # outputs
    out1_ref,       # (R, PC)
    out2_ref,       # (R, PP)
    *, n_layers, n_head, rows_per_batch):

    f32 = jnp.float32
    PC, D = pw_ref.shape
    DFF = w1_ref.shape[2]
    QW = wqkv_ref.shape[2]
    H1W = wh1_ref.shape[1]
    PP = wb_ref.shape[1]
    dh = D // n_head
    scale = 1.0 / math.sqrt(dh)

    x = x_ref[...]
    cavg = cavg_ref[...]
    bavg = bavg_ref[...]

    # ---- RevIN ('norm'): per-batch, per-channel stats via two tiny averaging matmuls ----
    # (bavg @ X @ cavg)[r, j] = mean over batch(r)'s rows and channel(j)'s columns.
    mean_b = jnp.dot(jnp.dot(bavg, x, preferred_element_type=f32), cavg,
                     preferred_element_type=f32)
    cen = x - mean_b
    var_b = jnp.dot(jnp.dot(bavg, cen * cen, preferred_element_type=f32), cavg,
                    preferred_element_type=f32)                      # unbiased=False
    xn = cen * jax.lax.rsqrt(var_b + _REVIN_EPS) * vec_ref[R_RW:R_RW + 1, :PC]
    xn = xn + perb_ref[...]                                          # + (revin_b + pos-emb)

    # ---- to_patch_embedding: LayerNorm -> Linear -> LayerNorm ----
    h = _layernorm(xn, vec_ref[R_PG1:R_PG1 + 1, :PC], vec_ref[R_PB1:R_PB1 + 1, :PC])
    h = jnp.dot(h, pw_ref[...], preferred_element_type=f32) + vec_ref[R_PBW:R_PBW + 1, :D]
    h = _layernorm(h, vec_ref[R_PG2:R_PG2 + 1, :D], vec_ref[R_PB2:R_PB2 + 1, :D])

    # block-diagonal (same-batch only) additive attention mask, derived from bavg:
    # same batch -> 0, different batch -> -1e30 (exp underflows to exactly 0).
    attn_mask = (bavg * float(rows_per_batch) - 1.0) * _NEG_BIG

    # ---- encoder layers (static loop; all layer weights resident in VMEM) ----
    for li in range(n_layers):
        base = N_FIXED + li * PER_LAYER
        xl = h

        # fused QKV projection: one (R, D) x (D, 3D->QW) matmul
        qkv = (jnp.dot(xl, wqkv_ref[li], preferred_element_type=f32)
               + vec_ref[base + L_BQKV:base + L_BQKV + 1, :QW])

        ctx = []
        for hd in range(n_head):                                     # static head loop
            q_h = qkv[:, hd * dh:(hd + 1) * dh]
            k_h = qkv[:, D + hd * dh:D + (hd + 1) * dh]
            v_h = qkv[:, 2 * D + hd * dh:2 * D + (hd + 1) * dh]
            s = jax.lax.dot_general(q_h, k_h, (((1,), (1,)), ((), ())),
                                    preferred_element_type=f32) * scale + attn_mask
            p = _softmax(s)
            ctx.append(jnp.dot(p, v_h, preferred_element_type=f32))
        ctx = jnp.concatenate(ctx, axis=-1)                          # (R, D)

        # single fused out-projection on the head-concatenated context
        attn = (jnp.dot(ctx, wo_ref[li], preferred_element_type=f32)
                + vec_ref[base + L_BO:base + L_BO + 1, :D])

        x1 = _layernorm(xl + attn,
                        vec_ref[base + L_G1:base + L_G1 + 1, :D],
                        vec_ref[base + L_B1:base + L_B1 + 1, :D])    # norm1(x + attn)
        f = (jnp.dot(x1, w1_ref[li], preferred_element_type=f32)
             + vec_ref[base + L_BF1:base + L_BF1 + 1, :DFF])
        f = _gelu(f)
        f = (jnp.dot(f, w2_ref[li], preferred_element_type=f32)
             + vec_ref[base + L_BF2:base + L_BF2 + 1, :D])
        h = _layernorm(x1 + f,
                       vec_ref[base + L_G2:base + L_G2 + 1, :D],
                       vec_ref[base + L_B2:base + L_B2 + 1, :D])     # norm2(x1 + ffn)

    # ---- final encoder LayerNorm + fused [projection | projection2[0]] + projection2 ----
    xf = _layernorm(h, vec_ref[R_GF:R_GF + 1, :D], vec_ref[R_BF:R_BF + 1, :D])
    t = jnp.dot(xf, wh1_ref[...], preferred_element_type=f32) + vec_ref[R_BH1:R_BH1 + 1, :H1W]
    out1_ref[...] = t[:, :PC]                                        # projection output
    a = jnp.maximum(t[:, PC:PC + D], 0.0)                            # ReLU branch
    out2_ref[...] = (jnp.dot(a, wb_ref[...], preferred_element_type=f32)
                     + vec_ref[R_BB:R_BB + 1, :PP])


# -------------------------------- pallas_call glue ------------------------------ #

def _shared_spec(shape):
    # Whole (small) weight array; constant block index => DMA'd once, stays in VMEM.
    # (At larger sizes one would add pipeline_mode=pl.Buffered(1) to single-buffer these.)
    n = len(shape)
    return pl.BlockSpec(tuple(shape), lambda i, _n=n: (0,) * _n)


def contad_forward(params, x, *, patch_size, n_head):
    B, S, C = x.shape
    P = patch_size
    L = S // P
    PC = P * C
    D = params["patch"]["w"].shape[1]
    DFF = params["layers"][0]["w1"].shape[1]
    PP = params["head"]["wb"].shape[1]
    NL = len(params["layers"])
    dh = D // n_head

    # Fold the whole batch into the row dimension of a single grid step
    # (B*L = 8 rows = one full sublane group here).  For large B one would tile the
    # batch (grid=(B//BT,)) and on v7x mark that axis CORE_PARALLEL / use pl.core_map
    # so both TensorCores engage.
    BT = B
    R = BT * L
    nbt = B // BT

    # ---------------- wrapper-side layout plumbing (cheap XLA, no compute) ----------------
    # 'b (l p) c -> (b l) (p c)'  (contiguous reshapes)
    x_rows = x.reshape(B, L, PC).reshape(B * L, PC)

    # RevIN averaging matrices: columns (same channel / P) and rows (same batch / L).
    cidx = jnp.arange(PC)
    cavg = (cidx[:, None] % C == cidx[None, :] % C).astype(jnp.float32) / P
    ridx = jnp.arange(R)
    bavg = (ridx[:, None] // L == ridx[None, :] // L).astype(jnp.float32) / L

    # positional embedding (broadcast over channels) + RevIN affine bias, in row layout
    pe_lp = params["pe"][:S, 0].reshape(L, P)                        # sin(s/S)
    pe_pc = jnp.repeat(pe_lp, C, axis=1)                             # (L, PC)
    rb_pc = jnp.tile(params["revin_b"].reshape(-1), P)[None, :]      # (1, PC)
    perb = jnp.tile(pe_pc, (BT, 1)) + rb_pc                          # (R, PC)

    pp_ = params["patch"]
    hp = params["head"]
    layers = params["layers"]

    # packed small-vector table (biases + LayerNorm gamma/beta), zero-padded rows
    VW = _round_up(max(PC, 3 * D, DFF, PC + D, PP, D), 128)

    def vrow(v):
        v = jnp.asarray(v, jnp.float32).reshape(-1)
        return jnp.pad(v, (0, VW - v.shape[0]))                      # padding stays zero

    rows = [
        vrow(jnp.tile(params["revin_w"].reshape(-1), P)),            # R_RW
        vrow(pp_["ln1_g"]), vrow(pp_["ln1_b"]),                      # R_PG1, R_PB1
        vrow(pp_["b"]),                                              # R_PBW
        vrow(pp_["ln2_g"]), vrow(pp_["ln2_b"]),                      # R_PG2, R_PB2
        vrow(hp["gf"]), vrow(hp["bf"]),                              # R_GF, R_BF
        vrow(jnp.concatenate([hp["bp"].reshape(-1), hp["ba"].reshape(-1)])),   # R_BH1
        vrow(hp["bb"]),                                              # R_BB
    ]
    for lp in layers:
        rows += [
            vrow(jnp.concatenate([lp["bq"].reshape(-1), lp["bk"].reshape(-1),
                                  lp["bv"].reshape(-1)])),           # L_BQKV
            vrow(lp["bo"]), vrow(lp["g1"]), vrow(lp["b1"]),
            vrow(lp["bf1"]), vrow(lp["bf2"]), vrow(lp["g2"]), vrow(lp["b2"]),
        ]
    vec = jnp.stack(rows)                                            # (N_FIXED + 8*NL, VW)

    # fused / stacked weights (lane-padded with zeros where needed)
    QW = _round_up(3 * D, 128)
    wqkv = jnp.stack([jnp.pad(jnp.concatenate([lp["wq"], lp["wk"], lp["wv"]], axis=1),
                              ((0, 0), (0, QW - 3 * D))) for lp in layers])
    wo_all = jnp.stack([lp["wo"] for lp in layers])
    w1_all = jnp.stack([lp["w1"] for lp in layers])
    w2_all = jnp.stack([lp["w2"] for lp in layers])
    H1W = _round_up(PC + D, 128)
    wh1 = jnp.pad(jnp.concatenate([hp["wp"], hp["wa"]], axis=1),
                  ((0, 0), (0, H1W - (PC + D))))
    wb_arr = hp["wb"]

    shared = [cavg, bavg, perb, vec, pp_["w"], wqkv, wo_all, w1_all, w2_all, wh1, wb_arr]

    # rough cost hint so XLA schedules the fused call sensibly
    per_layer_flops = (2 * R * D * 3 * D + n_head * (2 * R * R * dh) * 2
                       + 2 * R * D * D + 2 * R * D * DFF * 2)
    flops = nbt * (4 * R * R * PC + 4 * R * PC * PC + 2 * R * PC * D
                   + NL * per_layer_flops + 2 * R * D * H1W + 2 * R * D * PP)
    transcend = nbt * (NL * (n_head * R * R + R * DFF) + 8 * R)
    bytes_accessed = 4 * (sum(int(a.size) for a in ([x_rows] + shared)) + B * L * (PC + PP))
    cost = pl.CostEstimate(flops=int(flops), transcendentals=int(transcend),
                           bytes_accessed=int(bytes_accessed))

    out1, out2 = pl.pallas_call(
        functools.partial(fused_forward_kernel, n_layers=NL, n_head=n_head,
                          rows_per_batch=L),
        out_shape=(jax.ShapeDtypeStruct((B * L, PC), jnp.float32),
                   jax.ShapeDtypeStruct((B * L, PP), jnp.float32)),
        grid=(nbt,),
        in_specs=[pl.BlockSpec((R, PC), lambda i: (i, 0))] +
                 [_shared_spec(a.shape) for a in shared],
        out_specs=[pl.BlockSpec((R, PC), lambda i: (i, 0)),
                   pl.BlockSpec((R, PP), lambda i: (i, 0))],
        compiler_params=pltpu.CompilerParams(dimension_semantics=("parallel",)),
        cost_estimate=cost,
    )(x_rows, *shared)

    return out1.reshape(B, L, PC), out2.reshape(B, L, PP)


# -------------------------------- model parameters ------------------------------ #

def init_params(key, *, c_dim, seq_len, patch_size, d_model, n_layers,
                d_feed_forward, proj_dim):
    pc = patch_size * c_dim
    keys = iter(jax.random.split(key, 8 * (n_layers + 4)))

    def lin(fan_in, fan_out):
        w = jax.random.normal(next(keys), (fan_in, fan_out), jnp.float32) / math.sqrt(fan_in)
        b = jax.random.normal(next(keys), (1, fan_out), jnp.float32) * 0.01
        return w, b

    params = {
        "revin_w": jnp.ones((1, c_dim), jnp.float32),
        "revin_b": jnp.zeros((1, c_dim), jnp.float32),
        # MyPositionalEmbedding_wo_ch: sin(arange(max_len)/max_len)[None, :, None]
        "pe": jnp.sin(jnp.arange(seq_len, dtype=jnp.float32) / seq_len)[:, None],
    }

    pw, pb = lin(pc, d_model)
    params["patch"] = {
        "ln1_g": jnp.ones((1, pc), jnp.float32), "ln1_b": jnp.zeros((1, pc), jnp.float32),
        "w": pw, "b": pb,
        "ln2_g": jnp.ones((1, d_model), jnp.float32),
        "ln2_b": jnp.zeros((1, d_model), jnp.float32),
    }

    layer_list = []
    for _ in range(n_layers):
        wq, bq = lin(d_model, d_model)
        wk, bk = lin(d_model, d_model)
        wv, bv = lin(d_model, d_model)
        wo, bo = lin(d_model, d_model)
        w1, bf1 = lin(d_model, d_feed_forward)
        w2, bf2 = lin(d_feed_forward, d_model)
        layer_list.append({
            "wq": wq, "bq": bq, "wk": wk, "bk": bk, "wv": wv, "bv": bv,
            "wo": wo, "bo": bo,
            "g1": jnp.ones((1, d_model), jnp.float32), "b1": jnp.zeros((1, d_model), jnp.float32),
            "w1": w1, "bf1": bf1, "w2": w2, "bf2": bf2,
            "g2": jnp.ones((1, d_model), jnp.float32), "b2": jnp.zeros((1, d_model), jnp.float32),
        })
    params["layers"] = layer_list

    wp, bp = lin(d_model, pc)                          # projection
    wa, ba = lin(d_model, d_model)                     # projection2[0]
    wb, bb = lin(d_model, patch_size * proj_dim)       # projection2[2]
    params["head"] = {
        "gf": jnp.ones((1, d_model), jnp.float32), "bf": jnp.zeros((1, d_model), jnp.float32),
        "wp": wp, "bp": bp, "wa": wa, "ba": ba, "wb": wb, "bb": bb,
    }
    return params


# --------------------------- plain-JAX reference (sanity) ------------------------ #

def reference_forward(params, x, *, patch_size, n_head):
    B, S, C = x.shape
    P = patch_size
    L = S // P

    def ln(v, g, b):
        mu = jnp.mean(v, axis=-1, keepdims=True)
        var = jnp.mean((v - mu) ** 2, axis=-1, keepdims=True)
        return (v - mu) * jax.lax.rsqrt(var + _LN_EPS) * g + b

    mean = jnp.mean(x, axis=1, keepdims=True)
    var = jnp.mean((x - mean) ** 2, axis=1, keepdims=True)
    h = (x - mean) / jnp.sqrt(var + _REVIN_EPS)
    h = h * params["revin_w"].reshape(1, 1, C) + params["revin_b"].reshape(1, 1, C)
    h = h + params["pe"][:S].reshape(1, S, 1)
    h = h.reshape(B, L, P * C)

    pp = params["patch"]
    h = ln(h, pp["ln1_g"], pp["ln1_b"])
    h = h @ pp["w"] + pp["b"]
    h = ln(h, pp["ln2_g"], pp["ln2_b"])

    for lp in params["layers"]:
        D = h.shape[-1]
        dh = D // n_head
        q = (h @ lp["wq"] + lp["bq"]).reshape(B, L, n_head, dh).transpose(0, 2, 1, 3)
        k = (h @ lp["wk"] + lp["bk"]).reshape(B, L, n_head, dh).transpose(0, 2, 1, 3)
        v = (h @ lp["wv"] + lp["bv"]).reshape(B, L, n_head, dh).transpose(0, 2, 1, 3)
        s = jnp.einsum("bhnd,bhmd->bhnm", q, k) / math.sqrt(dh)
        p = jax.nn.softmax(s, axis=-1)
        o = jnp.einsum("bhnm,bhmd->bhnd", p, v).transpose(0, 2, 1, 3).reshape(B, L, D)
        o = o @ lp["wo"] + lp["bo"]
        x1 = ln(h + o, lp["g1"], lp["b1"])
        f = x1 @ lp["w1"] + lp["bf1"]
        f = 0.5 * f * (1.0 + jax.lax.erf(f * _INV_SQRT2))            # exact erf-GELU
        f = f @ lp["w2"] + lp["bf2"]
        h = ln(x1 + f, lp["g2"], lp["b2"])

    hd = params["head"]
    h = ln(h, hd["gf"], hd["bf"])
    out1 = h @ hd["wp"] + hd["bp"]
    t = jnp.maximum(h @ hd["wa"] + hd["ba"], 0.0)
    out2 = t @ hd["wb"] + hd["bb"]
    return out1, out2


# --------------------------------------- main ------------------------------------ #

if __name__ == "__main__":
    # small config consistent with the module: seq_len % patch_size == 0, d_model % n_head == 0
    B, C, S = 2, 4, 64
    PATCH, D, N_LAYERS, N_HEAD, PROJ = 16, 32, 2, 4, 10
    D_FF = D * 4
    L = S // PATCH

    key = jax.random.PRNGKey(0)
    k_param, k_x = jax.random.split(key)
    params = init_params(k_param, c_dim=C, seq_len=S, patch_size=PATCH, d_model=D,
                         n_layers=N_LAYERS, d_feed_forward=D_FF, proj_dim=PROJ)
    x = jax.random.normal(k_x, (B, S, C), jnp.float32)

    fwd = jax.jit(functools.partial(contad_forward, patch_size=PATCH, n_head=N_HEAD))
    x_out, sim_score = fwd(params, x)
    jax.block_until_ready((x_out, sim_score))

    assert x_out.shape == (B, L, PATCH * C), x_out.shape
    assert sim_score.shape == (B, L, PATCH * PROJ), sim_score.shape
    assert bool(jnp.all(jnp.isfinite(x_out))) and bool(jnp.all(jnp.isfinite(sim_score)))

    # numerical check against a plain-JAX reference of the same math.
    # HIGHEST precision on the reference so both sides compute ~f32 matmuls; typical
    # observed error is ~1e-5, assert at 1e-3 so real bugs are not masked.
    with jax.default_matmul_precision("highest"):
        r1, r2 = reference_forward(params, x, patch_size=PATCH, n_head=N_HEAD)
    err1 = float(jnp.max(jnp.abs(x_out - r1)))
    err2 = float(jnp.max(jnp.abs(sim_score - r2)))
    assert err1 < 1e-3 and err2 < 1e-3, (err1, err2)

    print("KERNEL_OK")
</pallas_src>

<mosaic_0001>
module attributes {stable_mosaic.version = 11 : i64} {
  func.func @fused_forward_kernel(%arg0: i32, %arg1: memref<8x64xf32, #tpu.memory_space<vmem>>, %arg2: memref<64x64xf32, #tpu.memory_space<vmem>>, %arg3: memref<8x8xf32, #tpu.memory_space<vmem>>, %arg4: memref<8x64xf32, #tpu.memory_space<vmem>>, %arg5: memref<26x256xf32, #tpu.memory_space<vmem>>, %arg6: memref<64x32xf32, #tpu.memory_space<vmem>>, %arg7: memref<2x32x128xf32, #tpu.memory_space<vmem>>, %arg8: memref<2x32x32xf32, #tpu.memory_space<vmem>>, %arg9: memref<2x32x128xf32, #tpu.memory_space<vmem>>, %arg10: memref<2x128x32xf32, #tpu.memory_space<vmem>>, %arg11: memref<32x128xf32, #tpu.memory_space<vmem>>, %arg12: memref<32x160xf32, #tpu.memory_space<vmem>>, %arg13: memref<8x64xf32, #tpu.memory_space<vmem>>, %arg14: memref<8x160xf32, #tpu.memory_space<vmem>>) attributes {dimension_semantics = [#tpu.dimension_semantics<parallel>], iteration_bounds = array<i64: 1>, scalar_prefetch = 0 : i64, scratch_operands = 0 : i64, tpu.core_type = #tpu.core_type<tc>, window_params = [{transform_indices = @transform_0, window_bounds = array<i64: 8, 64>}, {pipeline_mode = #tpu.pipeline_mode<synchronous>, transform_indices = @transform_1, window_bounds = array<i64: 64, 64>}, {pipeline_mode = #tpu.pipeline_mode<synchronous>, transform_indices = @transform_2, window_bounds = array<i64: 8, 8>}, {pipeline_mode = #tpu.pipeline_mode<synchronous>, transform_indices = @transform_3, window_bounds = array<i64: 8, 64>}, {pipeline_mode = #tpu.pipeline_mode<synchronous>, transform_indices = @transform_4, window_bounds = array<i64: 26, 256>}, {pipeline_mode = #tpu.pipeline_mode<synchronous>, transform_indices = @transform_5, window_bounds = array<i64: 64, 32>}, {pipeline_mode = #tpu.pipeline_mode<synchronous>, transform_indices = @transform_6, window_bounds = array<i64: 2, 32, 128>}, {pipeline_mode = #tpu.pipeline_mode<synchronous>, transform_indices = @transform_7, window_bounds = array<i64: 2, 32, 32>}, {pipeline_mode = #tpu.pipeline_mode<synchronous>, transform_indices = @transform_8, window_bounds = array<i64: 2, 32, 128>}, {pipeline_mode = #tpu.pipeline_mode<synchronous>, transform_indices = @transform_9, window_bounds = array<i64: 2, 128, 32>}, {pipeline_mode = #tpu.pipeline_mode<synchronous>, transform_indices = @transform_10, window_bounds = array<i64: 32, 128>}, {pipeline_mode = #tpu.pipeline_mode<synchronous>, transform_indices = @transform_11, window_bounds = array<i64: 32, 160>}, {transform_indices = @transform_12, window_bounds = array<i64: 8, 64>}, {transform_indices = @transform_13, window_bounds = array<i64: 8, 160>}]} {
    %c0 = arith.constant 0 : index
    %c0_0 = arith.constant 0 : index
    %0 = vector.load %arg1[%c0, %c0_0] : memref<8x64xf32, #tpu.memory_space<vmem>>, vector<8x64xf32>
    %c0_1 = arith.constant 0 : index
    %c0_2 = arith.constant 0 : index
    %1 = vector.load %arg2[%c0_1, %c0_2] : memref<64x64xf32, #tpu.memory_space<vmem>>, vector<64x64xf32>
    %c0_3 = arith.constant 0 : index
    %c0_4 = arith.constant 0 : index
    %2 = vector.load %arg3[%c0_3, %c0_4] : memref<8x8xf32, #tpu.memory_space<vmem>>, vector<8x8xf32>
    %cst = arith.constant dense<0.000000e+00> : vector<8x64xf32>
    %3 = tpu.matmul %2, %0, %cst {dimension_numbers = #tpu.dot_dimension_numbers<[1], [0], [0], [1], [0, 0, 1, 1], [], []>} : vector<8x8xf32>, vector<8x64xf32>, vector<8x64xf32> -> vector<8x64xf32>
    %cst_5 = arith.constant dense<0.000000e+00> : vector<8x64xf32>
    %4 = tpu.matmul %3, %1, %cst_5 {dimension_numbers = #tpu.dot_dimension_numbers<[1], [0], [0], [1], [0, 0, 1, 1], [], []>} : vector<8x64xf32>, vector<64x64xf32>, vector<8x64xf32> -> vector<8x64xf32>
    %5 = arith.subf %0, %4 : vector<8x64xf32>
    %6 = arith.mulf %5, %5 : vector<8x64xf32>
    %cst_6 = arith.constant dense<0.000000e+00> : vector<8x64xf32>
    %7 = tpu.matmul %2, %6, %cst_6 {dimension_numbers = #tpu.dot_dimension_numbers<[1], [0], [0], [1], [0, 0, 1, 1], [], []>} : vector<8x8xf32>, vector<8x64xf32>, vector<8x64xf32> -> vector<8x64xf32>
    %cst_7 = arith.constant dense<0.000000e+00> : vector<8x64xf32>
    %8 = tpu.matmul %7, %1, %cst_7 {dimension_numbers = #tpu.dot_dimension_numbers<[1], [0], [0], [1], [0, 0, 1, 1], [], []>} : vector<8x64xf32>, vector<64x64xf32>, vector<8x64xf32> -> vector<8x64xf32>
    %cst_8 = arith.constant 9.99999974E-6 : f32
    %9 = vector.broadcast %cst_8 : f32 to vector<8x64xf32>
    %10 = arith.addf %8, %9 : vector<8x64xf32>
    %11 = math.rsqrt %10 : vector<8x64xf32>
    %12 = arith.mulf %5, %11 : vector<8x64xf32>
    %c0_9 = arith.constant 0 : index
    %c0_10 = arith.constant 0 : index
    %13 = vector.load %arg5[%c0_9, %c0_10] : memref<26x256xf32, #tpu.memory_space<vmem>>, vector<1x64xf32>
    %14 = vector.broadcast %13 : vector<1x64xf32> to vector<8x64xf32>
    %15 = arith.mulf %12, %14 : vector<8x64xf32>
    %c0_11 = arith.constant 0 : index
    %c0_12 = arith.constant 0 : index
    %16 = vector.load %arg4[%c0_11, %c0_12] : memref<8x64xf32, #tpu.memory_space<vmem>>, vector<8x64xf32>
    %17 = arith.addf %15, %16 : vector<8x64xf32>
    %c1 = arith.constant 1 : index
    %c0_13 = arith.constant 0 : index
    %18 = vector.load %arg5[%c1, %c0_13] : memref<26x256xf32, #tpu.memory_space<vmem>>, vector<1x64xf32>
    %c2 = arith.constant 2 : index
    %c0_14 = arith.constant 0 : index
    %19 = vector.load %arg5[%c2, %c0_14] : memref<26x256xf32, #tpu.memory_space<vmem>>, vector<1x64xf32>
    %cst_15 = arith.constant dense<0.000000e+00> : vector<8xf32>
    %20 = vector.multi_reduction <add>, %17, %cst_15 [1] : vector<8x64xf32> to vector<8xf32>
    %21 = vector.shape_cast %20 : vector<8xf32> to vector<8x1xf32>
    %cst_16 = arith.constant 6.400000e+01 : f32
    %22 = vector.broadcast %cst_16 : f32 to vector<8x1xf32>
    %23 = arith.divf %21, %22 : vector<8x1xf32>
    %24 = vector.broadcast %23 : vector<8x1xf32> to vector<8x64xf32>
    %25 = arith.subf %17, %24 : vector<8x64xf32>
    %26 = arith.mulf %25, %25 : vector<8x64xf32>
    %cst_17 = arith.constant dense<0.000000e+00> : vector<8xf32>
    %27 = vector.multi_reduction <add>, %26, %cst_17 [1] : vector<8x64xf32> to vector<8xf32>
    %28 = vector.shape_cast %27 : vector<8xf32> to vector<8x1xf32>
    %cst_18 = arith.constant 6.400000e+01 : f32
    %29 = vector.broadcast %cst_18 : f32 to vector<8x1xf32>
    %30 = arith.divf %28, %29 : vector<8x1xf32>
    %31 = vector.broadcast %23 : vector<8x1xf32> to vector<8x64xf32>
    %32 = arith.subf %17, %31 : vector<8x64xf32>
    %cst_19 = arith.constant 9.99999974E-6 : f32
    %33 = vector.broadcast %cst_19 : f32 to vector<8x1xf32>
    %34 = arith.addf %30, %33 : vector<8x1xf32>
    %35 = math.rsqrt %34 : vector<8x1xf32>
    %36 = vector.broadcast %35 : vector<8x1xf32> to vector<8x64xf32>
    %37 = arith.mulf %32, %36 : vector<8x64xf32>
    %38 = vector.broadcast %18 : vector<1x64xf32> to vector<8x64xf32>
    %39 = arith.mulf %37, %38 : vector<8x64xf32>
    %40 = vector.broadcast %19 : vector<1x64xf32> to vector<8x64xf32>
    %41 = arith.addf %39, %40 : vector<8x64xf32>
    %c0_20 = arith.constant 0 : index
    %c0_21 = arith.constant 0 : index
    %42 = vector.load %arg6[%c0_20, %c0_21] : memref<64x32xf32, #tpu.memory_space<vmem>>, vector<64x32xf32>
    %cst_22 = arith.constant dense<0.000000e+00> : vector<8x32xf32>
    %43 = tpu.matmul %41, %42, %cst_22 {dimension_numbers = #tpu.dot_dimension_numbers<[1], [0], [0], [1], [0, 0, 1, 1], [], []>} : vector<8x64xf32>, vector<64x32xf32>, vector<8x32xf32> -> vector<8x32xf32>
    %c3 = arith.constant 3 : index
    %c0_23 = arith.constant 0 : index
    %44 = vector.load %arg5[%c3, %c0_23] : memref<26x256xf32, #tpu.memory_space<vmem>>, vector<1x32xf32>
    %45 = vector.broadcast %44 : vector<1x32xf32> to vector<8x32xf32>
    %46 = arith.addf %43, %45 : vector<8x32xf32>
    %c4 = arith.constant 4 : index
    %c0_24 = arith.constant 0 : index
    %47 = vector.load %arg5[%c4, %c0_24] : memref<26x256xf32, #tpu.memory_space<vmem>>, vector<1x32xf32>
    %c5 = arith.constant 5 : index
    %c0_25 = arith.constant 0 : index
    %48 = vector.load %arg5[%c5, %c0_25] : memref<26x256xf32, #tpu.memory_space<vmem>>, vector<1x32xf32>
    %cst_26 = arith.constant dense<0.000000e+00> : vector<8xf32>
    %49 = vector.multi_reduction <add>, %46, %cst_26 [1] : vector<8x32xf32> to vector<8xf32>
    %50 = vector.shape_cast %49 : vector<8xf32> to vector<8x1xf32>
    %cst_27 = arith.constant 3.200000e+01 : f32
    %51 = vector.broadcast %cst_27 : f32 to vector<8x1xf32>
    %52 = arith.divf %50, %51 : vector<8x1xf32>
    %53 = vector.broadcast %52 : vector<8x1xf32> to vector<8x32xf32>
    %54 = arith.subf %46, %53 : vector<8x32xf32>
    %55 = arith.mulf %54, %54 : vector<8x32xf32>
    %cst_28 = arith.constant dense<0.000000e+00> : vector<8xf32>
    %56 = vector.multi_reduction <add>, %55, %cst_28 [1] : vector<8x32xf32> to vector<8xf32>
    %57 = vector.shape_cast %56 : vector<8xf32> to vector<8x1xf32>
    %cst_29 = arith.constant 3.200000e+01 : f32
    %58 = vector.broadcast %cst_29 : f32 to vector<8x1xf32>
    %59 = arith.divf %57, %58 : vector<8x1xf32>
    %60 = vector.broadcast %52 : vector<8x1xf32> to vector<8x32xf32>
    %61 = arith.subf %46, %60 : vector<8x32xf32>
    %cst_30 = arith.constant 9.99999974E-6 : f32
    %62 = vector.broadcast %cst_30 : f32 to vector<8x1xf32>
    %63 = arith.addf %59, %62 : vector<8x1xf32>
    %64 = math.rsqrt %63 : vector<8x1xf32>
    %65 = vector.broadcast %64 : vector<8x1xf32> to vector<8x32xf32>
    %66 = arith.mulf %61, %65 : vector<8x32xf32>
    %67 = vector.broadcast %47 : vector<1x32xf32> to vector<8x32xf32>
    %68 = arith.mulf %66, %67 : vector<8x32xf32>
    %69 = vector.broadcast %48 : vector<1x32xf32> to vector<8x32xf32>
    %70 = arith.addf %68, %69 : vector<8x32xf32>
    %cst_31 = arith.constant 4.000000e+00 : f32
    %71 = vector.broadcast %cst_31 : f32 to vector<8x8xf32>
    %72 = arith.mulf %2, %71 : vector<8x8xf32>
    %cst_32 = arith.constant 1.000000e+00 : f32
    %73 = vector.broadcast %cst_32 : f32 to vector<8x8xf32>
    %74 = arith.subf %72, %73 : vector<8x8xf32>
    %cst_33 = arith.constant 1.000000e+30 : f32
    %75 = vector.broadcast %cst_33 : f32 to vector<8x8xf32>
    %76 = arith.mulf %74, %75 : vector<8x8xf32>
    %c0_34 = arith.constant 0 : index
    %c0_35 = arith.constant 0 : index
    %c0_36 = arith.constant 0 : index
    %77 = vector.load %arg7[%c0_34, %c0_35, %c0_36] : memref<2x32x128xf32, #tpu.memory_space<vmem>>, vector<1x32x128xf32>
    %78 = vector.shape_cast %77 : vector<1x32x128xf32> to vector<32x128xf32>
    %cst_37 = arith.constant dense<0.000000e+00> : vector<8x128xf32>
    %79 = tpu.matmul %70, %78, %cst_37 {dimension_numbers = #tpu.dot_dimension_numbers<[1], [0], [0], [1], [0, 0, 1, 1], [], []>} : vector<8x32xf32>, vector<32x128xf32>, vector<8x128xf32> -> vector<8x128xf32>
    %c10 = arith.constant 10 : index
    %c0_38 = arith.constant 0 : index
    %80 = vector.load %arg5[%c10, %c0_38] : memref<26x256xf32, #tpu.memory_space<vmem>>, vector<1x128xf32>
    %81 = vector.broadcast %80 : vector<1x128xf32> to vector<8x128xf32>
    %82 = arith.addf %79, %81 : vector<8x128xf32>
    %83 = vector.extract_strided_slice %82 {offsets = [0, 0], sizes = [8, 8], strides = [1, 1]} : vector<8x128xf32> to vector<8x8xf32>
    %84 = vector.extract_strided_slice %82 {offsets = [0, 32], sizes = [8, 8], strides = [1, 1]} : vector<8x128xf32> to vector<8x8xf32>
    %85 = vector.extract_strided_slice %82 {offsets = [0, 64], sizes = [8, 8], strides = [1, 1]} : vector<8x128xf32> to vector<8x8xf32>
    %cst_39 = arith.constant dense<0.000000e+00> : vector<8x8xf32>
    %86 = tpu.matmul %83, %84, %cst_39 {dimension_numbers = #tpu.dot_dimension_numbers<[1], [1], [0], [0], [0, 0, 1, 0], [], []>} : vector<8x8xf32>, vector<8x8xf32>, vector<8x8xf32> -> vector<8x8xf32>
    %cst_40 = arith.constant 0.353553385 : f32
    %87 = vector.broadcast %cst_40 : f32 to vector<8x8xf32>
    %88 = arith.mulf %86, %87 : vector<8x8xf32>
    %89 = arith.addf %88, %76 : vector<8x8xf32>
    %cst_41 = arith.constant dense<0xFF800000> : vector<8xf32>
    %90 = vector.multi_reduction <maximumf>, %89, %cst_41 [1] : vector<8x8xf32> to vector<8xf32>
    %91 = vector.shape_cast %90 : vector<8xf32> to vector<8x1xf32>
    %92 = vector.broadcast %91 : vector<8x1xf32> to vector<8x8xf32>
    %93 = arith.subf %89, %92 : vector<8x8xf32>
    %94 = math.exp %93 : vector<8x8xf32>
    %cst_42 = arith.constant dense<0.000000e+00> : vector<8xf32>
    %95 = vector.multi_reduction <add>, %94, %cst_42 [1] : vector<8x8xf32> to vector<8xf32>
    %96 = vector.shape_cast %95 : vector<8xf32> to vector<8x1xf32>
    %97 = vector.broadcast %96 : vector<8x1xf32> to vector<8x8xf32>
    %98 = arith.divf %94, %97 : vector<8x8xf32>
    %cst_43 = arith.constant dense<0.000000e+00> : vector<8x8xf32>
    %99 = tpu.matmul %98, %85, %cst_43 {dimension_numbers = #tpu.dot_dimension_numbers<[1], [0], [0], [1], [0, 0, 1, 1], [], []>} : vector<8x8xf32>, vector<8x8xf32>, vector<8x8xf32> -> vector<8x8xf32>
    %100 = vector.extract_strided_slice %82 {offsets = [0, 8], sizes = [8, 8], strides = [1, 1]} : vector<8x128xf32> to vector<8x8xf32>
    %101 = vector.extract_strided_slice %82 {offsets = [0, 40], sizes = [8, 8], strides = [1, 1]} : vector<8x128xf32> to vector<8x8xf32>
    %102 = vector.extract_strided_slice %82 {offsets = [0, 72], sizes = [8, 8], strides = [1, 1]} : vector<8x128xf32> to vector<8x8xf32>
    %cst_44 = arith.constant dense<0.000000e+00> : vector<8x8xf32>
    %103 = tpu.matmul %100, %101, %cst_44 {dimension_numbers = #tpu.dot_dimension_numbers<[1], [1], [0], [0], [0, 0, 1, 0], [], []>} : vector<8x8xf32>, vector<8x8xf32>, vector<8x8xf32> -> vector<8x8xf32>
    %cst_45 = arith.constant 0.353553385 : f32
    %104 = vector.broadcast %cst_45 : f32 to vector<8x8xf32>
    %105 = arith.mulf %103, %104 : vector<8x8xf32>
    %106 = arith.addf %105, %76 : vector<8x8xf32>
    %cst_46 = arith.constant dense<0xFF800000> : vector<8xf32>
    %107 = vector.multi_reduction <maximumf>, %106, %cst_46 [1] : vector<8x8xf32> to vector<8xf32>
    %108 = vector.shape_cast %107 : vector<8xf32> to vector<8x1xf32>
    %109 = vector.broadcast %108 : vector<8x1xf32> to vector<8x8xf32>
    %110 = arith.subf %106, %109 : vector<8x8xf32>
    %111 = math.exp %110 : vector<8x8xf32>
    %cst_47 = arith.constant dense<0.000000e+00> : vector<8xf32>
    %112 = vector.multi_reduction <add>, %111, %cst_47 [1] : vector<8x8xf32> to vector<8xf32>
    %113 = vector.shape_cast %112 : vector<8xf32> to vector<8x1xf32>
    %114 = vector.broadcast %113 : vector<8x1xf32> to vector<8x8xf32>
    %115 = arith.divf %111, %114 : vector<8x8xf32>
    %cst_48 = arith.constant dense<0.000000e+00> : vector<8x8xf32>
    %116 = tpu.matmul %115, %102, %cst_48 {dimension_numbers = #tpu.dot_dimension_numbers<[1], [0], [0], [1], [0, 0, 1, 1], [], []>} : vector<8x8xf32>, vector<8x8xf32>, vector<8x8xf32> -> vector<8x8xf32>
    %117 = vector.extract_strided_slice %82 {offsets = [0, 16], sizes = [8, 8], strides = [1, 1]} : vector<8x128xf32> to vector<8x8xf32>
    %118 = vector.extract_strided_slice %82 {offsets = [0, 48], sizes = [8, 8], strides = [1, 1]} : vector<8x128xf32> to vector<8x8xf32>
    %119 = vector.extract_strided_slice %82 {offsets = [0, 80], sizes = [8, 8], strides = [1, 1]} : vector<8x128xf32> to vector<8x8xf32>
    %cst_49 = arith.constant dense<0.000000e+00> : vector<8x8xf32>
    %120 = tpu.matmul %117, %118, %cst_49 {dimension_numbers = #tpu.dot_dimension_numbers<[1], [1], [0], [0], [0, 0, 1, 0], [], []>} : vector<8x8xf32>, vector<8x8xf32>, vector<8x8xf32> -> vector<8x8xf32>
    %cst_50 = arith.constant 0.353553385 : f32
    %121 = vector.broadcast %cst_50 : f32 to vector<8x8xf32>
    %122 = arith.mulf %120, %121 : vector<8x8xf32>
    %123 = arith.addf %122, %76 : vector<8x8xf32>
    %cst_51 = arith.constant dense<0xFF800000> : vector<8xf32>
    %124 = vector.multi_reduction <maximumf>, %123, %cst_51 [1] : vector<8x8xf32> to vector<8xf32>
    %125 = vector.shape_cast %124 : vector<8xf32> to vector<8x1xf32>
    %126 = vector.broadcast %125 : vector<8x1xf32> to vector<8x8xf32>
    %127 = arith.subf %123, %126 : vector<8x8xf32>
    %128 = math.exp %127 : vector<8x8xf32>
    %cst_52 = arith.constant dense<0.000000e+00> : vector<8xf32>
    %129 = vector.multi_reduction <add>, %128, %cst_52 [1] : vector<8x8xf32> to vector<8xf32>
    %130 = vector.shape_cast %129 : vector<8xf32> to vector<8x1xf32>
    %131 = vector.broadcast %130 : vector<8x1xf32> to vector<8x8xf32>
    %132 = arith.divf %128, %131 : vector<8x8xf32>
    %cst_53 = arith.constant dense<0.000000e+00> : vector<8x8xf32>
    %133 = tpu.matmul %132, %119, %cst_53 {dimension_numbers = #tpu.dot_dimension_numbers<[1], [0], [0], [1], [0, 0, 1, 1], [], []>} : vector<8x8xf32>, vector<8x8xf32>, vector<8x8xf32> -> vector<8x8xf32>
    %134 = vector.extract_strided_slice %82 {offsets = [0, 24], sizes = [8, 8], strides = [1, 1]} : vector<8x128xf32> to vector<8x8xf32>
    %135 = vector.extract_strided_slice %82 {offsets = [0, 56], sizes = [8, 8], strides = [1, 1]} : vector<8x128xf32> to vector<8x8xf32>
    %136 = vector.extract_strided_slice %82 {offsets = [0, 88], sizes = [8, 8], strides = [1, 1]} : vector<8x128xf32> to vector<8x8xf32>
    %cst_54 = arith.constant dense<0.000000e+00> : vector<8x8xf32>
    %137 = tpu.matmul %134, %135, %cst_54 {dimension_numbers = #tpu.dot_dimension_numbers<[1], [1], [0], [0], [0, 0, 1, 0], [], []>} : vector<8x8xf32>, vector<8x8xf32>, vector<8x8xf32> -> vector<8x8xf32>
    %cst_55 = arith.constant 0.353553385 : f32
    %138 = vector.broadcast %cst_55 : f32 to vector<8x8xf32>
    %139 = arith.mulf %137, %138 : vector<8x8xf32>
    %140 = arith.addf %139, %76 : vector<8x8xf32>
    %cst_56 = arith.constant dense<0xFF800000> : vector<8xf32>
    %141 = vector.multi_reduction <maximumf>, %140, %cst_56 [1] : vector<8x8xf32> to vector<8xf32>
    %142 = vector.shape_cast %141 : vector<8xf32> to vector<8x1xf32>
    %143 = vector.broadcast %142 : vector<8x1xf32> to vector<8x8xf32>
    %144 = arith.subf %140, %143 : vector<8x8xf32>
    %145 = math.exp %144 : vector<8x8xf32>
    %cst_57 = arith.constant dense<0.000000e+00> : vector<8xf32>
    %146 = vector.multi_reduction <add>, %145, %cst_57 [1] : vector<8x8xf32> to vector<8xf32>
    %147 = vector.shape_cast %146 : vector<8xf32> to vector<8x1xf32>
    %148 = vector.broadcast %147 : vector<8x1xf32> to vector<8x8xf32>
    %149 = arith.divf %145, %148 : vector<8x8xf32>
    %cst_58 = arith.constant dense<0.000000e+00> : vector<8x8xf32>
    %150 = tpu.matmul %149, %136, %cst_58 {dimension_numbers = #tpu.dot_dimension_numbers<[1], [0], [0], [1], [0, 0, 1, 1], [], []>} : vector<8x8xf32>, vector<8x8xf32>, vector<8x8xf32> -> vector<8x8xf32>
    %151 = tpu.concatenate %99, %116, %133, %150 in 1 : vector<8x8xf32>, vector<8x8xf32>, vector<8x8xf32>, vector<8x8xf32> -> vector<8x32xf32>
    %c0_59 = arith.constant 0 : index
    %c0_60 = arith.constant 0 : index
    %c0_61 = arith.constant 0 : index
    %152 = vector.load %arg8[%c0_59, %c0_60, %c0_61] : memref<2x32x32xf32, #tpu.memory_space<vmem>>, vector<1x32x32xf32>
    %153 = vector.shape_cast %152 : vector<1x32x32xf32> to vector<32x32xf32>
    %cst_62 = arith.constant dense<0.000000e+00> : vector<8x32xf32>
    %154 = tpu.matmul %151, %153, %cst_62 {dimension_numbers = #tpu.dot_dimension_numbers<[1], [0], [0], [1], [0, 0, 1, 1], [], []>} : vector<8x32xf32>, vector<32x32xf32>, vector<8x32xf32> -> vector<8x32xf32>
    %c11 = arith.constant 11 : index
    %c0_63 = arith.constant 0 : index
    %155 = vector.load %arg5[%c11, %c0_63] : memref<26x256xf32, #tpu.memory_space<vmem>>, vector<1x32xf32>
    %156 = vector.broadcast %155 : vector<1x32xf32> to vector<8x32xf32>
    %157 = arith.addf %154, %156 : vector<8x32xf32>
    %158 = arith.addf %70, %157 : vector<8x32xf32>
    %c12 = arith.constant 12 : index
    %c0_64 = arith.constant 0 : index
    %159 = vector.load %arg5[%c12, %c0_64] : memref<26x256xf32, #tpu.memory_space<vmem>>, vector<1x32xf32>
    %c13 = arith.constant 13 : index
    %c0_65 = arith.constant 0 : index
    %160 = vector.load %arg5[%c13, %c0_65] : memref<26x256xf32, #tpu.memory_space<vmem>>, vector<1x32xf32>
    %cst_66 = arith.constant dense<0.000000e+00> : vector<8xf32>
    %161 = vector.multi_reduction <add>, %158, %cst_66 [1] : vector<8x32xf32> to vector<8xf32>
    %162 = vector.shape_cast %161 : vector<8xf32> to vector<8x1xf32>
    %cst_67 = arith.constant 3.200000e+01 : f32
    %163 = vector.broadcast %cst_67 : f32 to vector<8x1xf32>
    %164 = arith.divf %162, %163 : vector<8x1xf32>
    %165 = vector.broadcast %164 : vector<8x1xf32> to vector<8x32xf32>
    %166 = arith.subf %158, %165 : vector<8x32xf32>
    %167 = arith.mulf %166, %166 : vector<8x32xf32>
    %cst_68 = arith.constant dense<0.000000e+00> : vector<8xf32>
    %168 = vector.multi_reduction <add>, %167, %cst_68 [1] : vector<8x32xf32> to vector<8xf32>
    %169 = vector.shape_cast %168 : vector<8xf32> to vector<8x1xf32>
    %cst_69 = arith.constant 3.200000e+01 : f32
    %170 = vector.broadcast %cst_69 : f32 to vector<8x1xf32>
    %171 = arith.divf %169, %170 : vector<8x1xf32>
    %172 = vector.broadcast %164 : vector<8x1xf32> to vector<8x32xf32>
    %173 = arith.subf %158, %172 : vector<8x32xf32>
    %cst_70 = arith.constant 9.99999974E-6 : f32
    %174 = vector.broadcast %cst_70 : f32 to vector<8x1xf32>
    %175 = arith.addf %171, %174 : vector<8x1xf32>
    %176 = math.rsqrt %175 : vector<8x1xf32>
    %177 = vector.broadcast %176 : vector<8x1xf32> to vector<8x32xf32>
    %178 = arith.mulf %173, %177 : vector<8x32xf32>
    %179 = vector.broadcast %159 : vector<1x32xf32> to vector<8x32xf32>
    %180 = arith.mulf %178, %179 : vector<8x32xf32>
    %181 = vector.broadcast %160 : vector<1x32xf32> to vector<8x32xf32>
    %182 = arith.addf %180, %181 : vector<8x32xf32>
    %c0_71 = arith.constant 0 : index
    %c0_72 = arith.constant 0 : index
    %c0_73 = arith.constant 0 : index
    %183 = vector.load %arg9[%c0_71, %c0_72, %c0_73] : memref<2x32x128xf32, #tpu.memory_space<vmem>>, vector<1x32x128xf32>
    %184 = vector.shape_cast %183 : vector<1x32x128xf32> to vector<32x128xf32>
    %cst_74 = arith.constant dense<0.000000e+00> : vector<8x128xf32>
    %185 = tpu.matmul %182, %184, %cst_74 {dimension_numbers = #tpu.dot_dimension_numbers<[1], [0], [0], [1], [0, 0, 1, 1], [], []>} : vector<8x32xf32>, vector<32x128xf32>, vector<8x128xf32> -> vector<8x128xf32>
    %c14 = arith.constant 14 : index
    %c0_75 = arith.constant 0 : index
    %186 = vector.load %arg5[%c14, %c0_75] : memref<26x256xf32, #tpu.memory_space<vmem>>, vector<1x128xf32>
    %187 = vector.broadcast %186 : vector<1x128xf32> to vector<8x128xf32>
    %188 = arith.addf %185, %187 : vector<8x128xf32>
    %cst_76 = arith.constant 5.000000e-01 : f32
    %189 = vector.broadcast %cst_76 : f32 to vector<8x128xf32>
    %190 = arith.mulf %189, %188 : vector<8x128xf32>
    %cst_77 = arith.constant 0.707106769 : f32
    %191 = vector.broadcast %cst_77 : f32 to vector<8x128xf32>
    %192 = arith.mulf %188, %191 : vector<8x128xf32>
    %193 = math.absf %192 : vector<8x128xf32>
    %cst_78 = arith.constant 0.327591091 : f32
    %194 = vector.broadcast %cst_78 : f32 to vector<8x128xf32>
    %195 = arith.mulf %194, %193 : vector<8x128xf32>
    %cst_79 = arith.constant 1.000000e+00 : f32
    %196 = vector.broadcast %cst_79 : f32 to vector<8x128xf32>
    %197 = arith.addf %196, %195 : vector<8x128xf32>
    %cst_80 = arith.constant 1.000000e+00 : f32
    %198 = vector.broadcast %cst_80 : f32 to vector<8x128xf32>
    %199 = arith.divf %198, %197 : vector<8x128xf32>
    %cst_81 = arith.constant 1.06140542 : f32
    %200 = vector.broadcast %cst_81 : f32 to vector<8x128xf32>
    %201 = arith.mulf %200, %199 : vector<8x128xf32>
    %cst_82 = arith.constant 1.45315206 : f32
    %202 = vector.broadcast %cst_82 : f32 to vector<8x128xf32>
    %203 = arith.subf %201, %202 : vector<8x128xf32>
    %204 = arith.mulf %203, %199 : vector<8x128xf32>
    %cst_83 = arith.constant 1.42141378 : f32
    %205 = vector.broadcast %cst_83 : f32 to vector<8x128xf32>
    %206 = arith.addf %204, %205 : vector<8x128xf32>
    %207 = arith.mulf %206, %199 : vector<8x128xf32>
    %cst_84 = arith.constant 0.284496725 : f32
    %208 = vector.broadcast %cst_84 : f32 to vector<8x128xf32>
    %209 = arith.subf %207, %208 : vector<8x128xf32>
    %210 = arith.mulf %209, %199 : vector<8x128xf32>
    %cst_85 = arith.constant 0.254829586 : f32
    %211 = vector.broadcast %cst_85 : f32 to vector<8x128xf32>
    %212 = arith.addf %210, %211 : vector<8x128xf32>
    %213 = arith.mulf %212, %199 : vector<8x128xf32>
    %cst_86 = arith.constant 0.000000e+00 : f32
    %214 = vector.broadcast %cst_86 : f32 to vector<8x128xf32>
    %215 = arith.subf %214, %193 : vector<8x128xf32>
    %216 = arith.mulf %215, %193 : vector<8x128xf32>
    %217 = math.exp %216 : vector<8x128xf32>
    %218 = arith.mulf %213, %217 : vector<8x128xf32>
    %cst_87 = arith.constant 1.000000e+00 : f32
    %219 = vector.broadcast %cst_87 : f32 to vector<8x128xf32>
    %220 = arith.subf %219, %218 : vector<8x128xf32>
    %cst_88 = arith.constant 0.000000e+00 : f32
    %221 = vector.broadcast %cst_88 : f32 to vector<8x128xf32>
    %222 = arith.cmpf olt, %192, %221 : vector<8x128xf32>
    %cst_89 = arith.constant 0.000000e+00 : f32
    %223 = vector.broadcast %cst_89 : f32 to vector<8x128xf32>
    %224 = arith.subf %223, %220 : vector<8x128xf32>
    %225 = arith.select %222, %224, %220 : vector<8x128xi1>, vector<8x128xf32>
    %cst_90 = arith.constant 1.000000e+00 : f32
    %226 = vector.broadcast %cst_90 : f32 to vector<8x128xf32>
    %227 = arith.addf %226, %225 : vector<8x128xf32>
    %228 = arith.mulf %190, %227 : vector<8x128xf32>
    %c0_91 = arith.constant 0 : index
    %c0_92 = arith.constant 0 : index
    %c0_93 = arith.constant 0 : index
    %229 = vector.load %arg10[%c0_91, %c0_92, %c0_93] : memref<2x128x32xf32, #tpu.memory_space<vmem>>, vector<1x128x32xf32>
    %230 = vector.shape_cast %229 : vector<1x128x32xf32> to vector<128x32xf32>
    %cst_94 = arith.constant dense<0.000000e+00> : vector<8x32xf32>
    %231 = tpu.matmul %228, %230, %cst_94 {dimension_numbers = #tpu.dot_dimension_numbers<[1], [0], [0], [1], [0, 0, 1, 1], [], []>} : vector<8x128xf32>, vector<128x32xf32>, vector<8x32xf32> -> vector<8x32xf32>
    %c15 = arith.constant 15 : index
    %c0_95 = arith.constant 0 : index
    %232 = vector.load %arg5[%c15, %c0_95] : memref<26x256xf32, #tpu.memory_space<vmem>>, vector<1x32xf32>
    %233 = vector.broadcast %232 : vector<1x32xf32> to vector<8x32xf32>
    %234 = arith.addf %231, %233 : vector<8x32xf32>
    %235 = arith.addf %182, %234 : vector<8x32xf32>
    %c16 = arith.constant 16 : index
    %c0_96 = arith.constant 0 : index
    %236 = vector.load %arg5[%c16, %c0_96] : memref<26x256xf32, #tpu.memory_space<vmem>>, vector<1x32xf32>
    %c17 = arith.constant 17 : index
    %c0_97 = arith.constant 0 : index
    %237 = vector.load %arg5[%c17, %c0_97] : memref<26x256xf32, #tpu.memory_space<vmem>>, vector<1x32xf32>
    %cst_98 = arith.constant dense<0.000000e+00> : vector<8xf32>
    %238 = vector.multi_reduction <add>, %235, %cst_98 [1] : vector<8x32xf32> to vector<8xf32>
    %239 = vector.shape_cast %238 : vector<8xf32> to vector<8x1xf32>
    %cst_99 = arith.constant 3.200000e+01 : f32
    %240 = vector.broadcast %cst_99 : f32 to vector<8x1xf32>
    %241 = arith.divf %239, %240 : vector<8x1xf32>
    %242 = vector.broadcast %241 : vector<8x1xf32> to vector<8x32xf32>
    %243 = arith.subf %235, %242 : vector<8x32xf32>
    %244 = arith.mulf %243, %243 : vector<8x32xf32>
    %cst_100 = arith.constant dense<0.000000e+00> : vector<8xf32>
    %245 = vector.multi_reduction <add>, %244, %cst_100 [1] : vector<8x32xf32> to vector<8xf32>
    %246 = vector.shape_cast %245 : vector<8xf32> to vector<8x1xf32>
    %cst_101 = arith.constant 3.200000e+01 : f32
    %247 = vector.broadcast %cst_101 : f32 to vector<8x1xf32>
    %248 = arith.divf %246, %247 : vector<8x1xf32>
    %249 = vector.broadcast %241 : vector<8x1xf32> to vector<8x32xf32>
    %250 = arith.subf %235, %249 : vector<8x32xf32>
    %cst_102 = arith.constant 9.99999974E-6 : f32
    %251 = vector.broadcast %cst_102 : f32 to vector<8x1xf32>
    %252 = arith.addf %248, %251 : vector<8x1xf32>
    %253 = math.rsqrt %252 : vector<8x1xf32>
    %254 = vector.broadcast %253 : vector<8x1xf32> to vector<8x32xf32>
    %255 = arith.mulf %250, %254 : vector<8x32xf32>
    %256 = vector.broadcast %236 : vector<1x32xf32> to vector<8x32xf32>
    %257 = arith.mulf %255, %256 : vector<8x32xf32>
    %258 = vector.broadcast %237 : vector<1x32xf32> to vector<8x32xf32>
    %259 = arith.addf %257, %258 : vector<8x32xf32>
    %c1_103 = arith.constant 1 : index
    %c0_104 = arith.constant 0 : index
    %c0_105 = arith.constant 0 : index
    %260 = vector.load %arg7[%c1_103, %c0_104, %c0_105] : memref<2x32x128xf32, #tpu.memory_space<vmem>>, vector<1x32x128xf32>
    %261 = vector.shape_cast %260 : vector<1x32x128xf32> to vector<32x128xf32>
    %cst_106 = arith.constant dense<0.000000e+00> : vector<8x128xf32>
    %262 = tpu.matmul %259, %261, %cst_106 {dimension_numbers = #tpu.dot_dimension_numbers<[1], [0], [0], [1], [0, 0, 1, 1], [], []>} : vector<8x32xf32>, vector<32x128xf32>, vector<8x128xf32> -> vector<8x128xf32>
    %c18 = arith.constant 18 : index
    %c0_107 = arith.constant 0 : index
    %263 = vector.load %arg5[%c18, %c0_107] : memref<26x256xf32, #tpu.memory_space<vmem>>, vector<1x128xf32>
    %264 = vector.broadcast %263 : vector<1x128xf32> to vector<8x128xf32>
    %265 = arith.addf %262, %264 : vector<8x128xf32>
    %266 = vector.extract_strided_slice %265 {offsets = [0, 0], sizes = [8, 8], strides = [1, 1]} : vector<8x128xf32> to vector<8x8xf32>
    %267 = vector.extract_strided_slice %265 {offsets = [0, 32], sizes = [8, 8], strides = [1, 1]} : vector<8x128xf32> to vector<8x8xf32>
    %268 = vector.extract_strided_slice %265 {offsets = [0, 64], sizes = [8, 8], strides = [1, 1]} : vector<8x128xf32> to vector<8x8xf32>
    %cst_108 = arith.constant dense<0.000000e+00> : vector<8x8xf32>
    %269 = tpu.matmul %266, %267, %cst_108 {dimension_numbers = #tpu.dot_dimension_numbers<[1], [1], [0], [0], [0, 0, 1, 0], [], []>} : vector<8x8xf32>, vector<8x8xf32>, vector<8x8xf32> -> vector<8x8xf32>
    %cst_109 = arith.constant 0.353553385 : f32
    %270 = vector.broadcast %cst_109 : f32 to vector<8x8xf32>
    %271 = arith.mulf %269, %270 : vector<8x8xf32>
    %272 = arith.addf %271, %76 : vector<8x8xf32>
    %cst_110 = arith.constant dense<0xFF800000> : vector<8xf32>
    %273 = vector.multi_reduction <maximumf>, %272, %cst_110 [1] : vector<8x8xf32> to vector<8xf32>
    %274 = vector.shape_cast %273 : vector<8xf32> to vector<8x1xf32>
    %275 = vector.broadcast %274 : vector<8x1xf32> to vector<8x8xf32>
    %276 = arith.subf %272, %275 : vector<8x8xf32>
    %277 = math.exp %276 : vector<8x8xf32>
    %cst_111 = arith.constant dense<0.000000e+00> : vector<8xf32>
    %278 = vector.multi_reduction <add>, %277, %cst_111 [1] : vector<8x8xf32> to vector<8xf32>
    %279 = vector.shape_cast %278 : vector<8xf32> to vector<8x1xf32>
    %280 = vector.broadcast %279 : vector<8x1xf32> to vector<8x8xf32>
    %281 = arith.divf %277, %280 : vector<8x8xf32>
    %cst_112 = arith.constant dense<0.000000e+00> : vector<8x8xf32>
    %282 = tpu.matmul %281, %268, %cst_112 {dimension_numbers = #tpu.dot_dimension_numbers<[1], [0], [0], [1], [0, 0, 1, 1], [], []>} : vector<8x8xf32>, vector<8x8xf32>, vector<8x8xf32> -> vector<8x8xf32>
    %283 = vector.extract_strided_slice %265 {offsets = [0, 8], sizes = [8, 8], strides = [1, 1]} : vector<8x128xf32> to vector<8x8xf32>
    %284 = vector.extract_strided_slice %265 {offsets = [0, 40], sizes = [8, 8], strides = [1, 1]} : vector<8x128xf32> to vector<8x8xf32>
    %285 = vector.extract_strided_slice %265 {offsets = [0, 72], sizes = [8, 8], strides = [1, 1]} : vector<8x128xf32> to vector<8x8xf32>
    %cst_113 = arith.constant dense<0.000000e+00> : vector<8x8xf32>
    %286 = tpu.matmul %283, %284, %cst_113 {dimension_numbers = #tpu.dot_dimension_numbers<[1], [1], [0], [0], [0, 0, 1, 0], [], []>} : vector<8x8xf32>, vector<8x8xf32>, vector<8x8xf32> -> vector<8x8xf32>
    %cst_114 = arith.constant 0.353553385 : f32
    %287 = vector.broadcast %cst_114 : f32 to vector<8x8xf32>
    %288 = arith.mulf %286, %287 : vector<8x8xf32>
    %289 = arith.addf %288, %76 : vector<8x8xf32>
    %cst_115 = arith.constant dense<0xFF800000> : vector<8xf32>
    %290 = vector.multi_reduction <maximumf>, %289, %cst_115 [1] : vector<8x8xf32> to vector<8xf32>
    %291 = vector.shape_cast %290 : vector<8xf32> to vector<8x1xf32>
    %292 = vector.broadcast %291 : vector<8x1xf32> to vector<8x8xf32>
    %293 = arith.subf %289, %292 : vector<8x8xf32>
    %294 = math.exp %293 : vector<8x8xf32>
    %cst_116 = arith.constant dense<0.000000e+00> : vector<8xf32>
    %295 = vector.multi_reduction <add>, %294, %cst_116 [1] : vector<8x8xf32> to vector<8xf32>
    %296 = vector.shape_cast %295 : vector<8xf32> to vector<8x1xf32>
    %297 = vector.broadcast %296 : vector<8x1xf32> to vector<8x8xf32>
    %298 = arith.divf %294, %297 : vector<8x8xf32>
    %cst_117 = arith.constant dense<0.000000e+00> : vector<8x8xf32>
    %299 = tpu.matmul %298, %285, %cst_117 {dimension_numbers = #tpu.dot_dimension_numbers<[1], [0], [0], [1], [0, 0, 1, 1], [], []>} : vector<8x8xf32>, vector<8x8xf32>, vector<8x8xf32> -> vector<8x8xf32>
    %300 = vector.extract_strided_slice %265 {offsets = [0, 16], sizes = [8, 8], strides = [1, 1]} : vector<8x128xf32> to vector<8x8xf32>
    %301 = vector.extract_strided_slice %265 {offsets = [0, 48], sizes = [8, 8], strides = [1, 1]} : vector<8x128xf32> to vector<8x8xf32>
    %302 = vector.extract_strided_slice %265 {offsets = [0, 80], sizes = [8, 8], strides = [1, 1]} : vector<8x128xf32> to vector<8x8xf32>
    %cst_118 = arith.constant dense<0.000000e+00> : vector<8x8xf32>
    %303 = tpu.matmul %300, %301, %cst_118 {dimension_numbers = #tpu.dot_dimension_numbers<[1], [1], [0], [0], [0, 0, 1, 0], [], []>} : vector<8x8xf32>, vector<8x8xf32>, vector<8x8xf32> -> vector<8x8xf32>
    %cst_119 = arith.constant 0.353553385 : f32
    %304 = vector.broadcast %cst_119 : f32 to vector<8x8xf32>
    %305 = arith.mulf %303, %304 : vector<8x8xf32>
    %306 = arith.addf %305, %76 : vector<8x8xf32>
    %cst_120 = arith.constant dense<0xFF800000> : vector<8xf32>
    %307 = vector.multi_reduction <maximumf>, %306, %cst_120 [1] : vector<8x8xf32> to vector<8xf32>
    %308 = vector.shape_cast %307 : vector<8xf32> to vector<8x1xf32>
    %309 = vector.broadcast %308 : vector<8x1xf32> to vector<8x8xf32>
    %310 = arith.subf %306, %309 : vector<8x8xf32>
    %311 = math.exp %310 : vector<8x8xf32>
    %cst_121 = arith.constant dense<0.000000e+00> : vector<8xf32>
    %312 = vector.multi_reduction <add>, %311, %cst_121 [1] : vector<8x8xf32> to vector<8xf32>
    %313 = vector.shape_cast %312 : vector<8xf32> to vector<8x1xf32>
    %314 = vector.broadcast %313 : vector<8x1xf32> to vector<8x8xf32>
    %315 = arith.divf %311, %314 : vector<8x8xf32>
    %cst_122 = arith.constant dense<0.000000e+00> : vector<8x8xf32>
    %316 = tpu.matmul %315, %302, %cst_122 {dimension_numbers = #tpu.dot_dimension_numbers<[1], [0], [0], [1], [0, 0, 1, 1], [], []>} : vector<8x8xf32>, vector<8x8xf32>, vector<8x8xf32> -> vector<8x8xf32>
    %317 = vector.extract_strided_slice %265 {offsets = [0, 24], sizes = [8, 8], strides = [1, 1]} : vector<8x128xf32> to vector<8x8xf32>
    %318 = vector.extract_strided_slice %265 {offsets = [0, 56], sizes = [8, 8], strides = [1, 1]} : vector<8x128xf32> to vector<8x8xf32>
    %319 = vector.extract_strided_slice %265 {offsets = [0, 88], sizes = [8, 8], strides = [1, 1]} : vector<8x128xf32> to vector<8x8xf32>
    %cst_123 = arith.constant dense<0.000000e+00> : vector<8x8xf32>
    %320 = tpu.matmul %317, %318, %cst_123 {dimension_numbers = #tpu.dot_dimension_numbers<[1], [1], [0], [0], [0, 0, 1, 0], [], []>} : vector<8x8xf32>, vector<8x8xf32>, vector<8x8xf32> -> vector<8x8xf32>
    %cst_124 = arith.constant 0.353553385 : f32
    %321 = vector.broadcast %cst_124 : f32 to vector<8x8xf32>
    %322 = arith.mulf %320, %321 : vector<8x8xf32>
    %323 = arith.addf %322, %76 : vector<8x8xf32>
    %cst_125 = arith.constant dense<0xFF800000> : vector<8xf32>
    %324 = vector.multi_reduction <maximumf>, %323, %cst_125 [1] : vector<8x8xf32> to vector<8xf32>
    %325 = vector.shape_cast %324 : vector<8xf32> to vector<8x1xf32>
    %326 = vector.broadcast %325 : vector<8x1xf32> to vector<8x8xf32>
    %327 = arith.subf %323, %326 : vector<8x8xf32>
    %328 = math.exp %327 : vector<8x8xf32>
    %cst_126 = arith.constant dense<0.000000e+00> : vector<8xf32>
    %329 = vector.multi_reduction <add>, %328, %cst_126 [1] : vector<8x8xf32> to vector<8xf32>
    %330 = vector.shape_cast %329 : vector<8xf32> to vector<8x1xf32>
    %331 = vector.broadcast %330 : vector<8x1xf32> to vector<8x8xf32>
    %332 = arith.divf %328, %331 : vector<8x8xf32>
    %cst_127 = arith.constant dense<0.000000e+00> : vector<8x8xf32>
    %333 = tpu.matmul %332, %319, %cst_127 {dimension_numbers = #tpu.dot_dimension_numbers<[1], [0], [0], [1], [0, 0, 1, 1], [], []>} : vector<8x8xf32>, vector<8x8xf32>, vector<8x8xf32> -> vector<8x8xf32>
    %334 = tpu.concatenate %282, %299, %316, %333 in 1 : vector<8x8xf32>, vector<8x8xf32>, vector<8x8xf32>, vector<8x8xf32> -> vector<8x32xf32>
    %c1_128 = arith.constant 1 : index
    %c0_129 = arith.constant 0 : index
    %c0_130 = arith.constant 0 : index
    %335 = vector.load %arg8[%c1_128, %c0_129, %c0_130] : memref<2x32x32xf32, #tpu.memory_space<vmem>>, vector<1x32x32xf32>
    %336 = vector.shape_cast %335 : vector<1x32x32xf32> to vector<32x32xf32>
    %cst_131 = arith.constant dense<0.000000e+00> : vector<8x32xf32>
    %337 = tpu.matmul %334, %336, %cst_131 {dimension_numbers = #tpu.dot_dimension_numbers<[1], [0], [0], [1], [0, 0, 1, 1], [], []>} : vector<8x32xf32>, vector<32x32xf32>, vector<8x32xf32> -> vector<8x32xf32>
    %c19 = arith.constant 19 : index
    %c0_132 = arith.constant 0 : index
    %338 = vector.load %arg5[%c19, %c0_132] : memref<26x256xf32, #tpu.memory_space<vmem>>, vector<1x32xf32>
    %339 = vector.broadcast %338 : vector<1x32xf32> to vector<8x32xf32>
    %340 = arith.addf %337, %339 : vector<8x32xf32>
    %341 = arith.addf %259, %340 : vector<8x32xf32>
    %c20 = arith.constant 20 : index
    %c0_133 = arith.constant 0 : index
    %342 = vector.load %arg5[%c20, %c0_133] : memref<26x256xf32, #tpu.memory_space<vmem>>, vector<1x32xf32>
    %c21 = arith.constant 21 : index
    %c0_134 = arith.constant 0 : index
    %343 = vector.load %arg5[%c21, %c0_134] : memref<26x256xf32, #tpu.memory_space<vmem>>, vector<1x32xf32>
    %cst_135 = arith.constant dense<0.000000e+00> : vector<8xf32>
    %344 = vector.multi_reduction <add>, %341, %cst_135 [1] : vector<8x32xf32> to vector<8xf32>
    %345 = vector.shape_cast %344 : vector<8xf32> to vector<8x1xf32>
    %cst_136 = arith.constant 3.200000e+01 : f32
    %346 = vector.broadcast %cst_136 : f32 to vector<8x1xf32>
    %347 = arith.divf %345, %346 : vector<8x1xf32>
    %348 = vector.broadcast %347 : vector<8x1xf32> to vector<8x32xf32>
    %349 = arith.subf %341, %348 : vector<8x32xf32>
    %350 = arith.mulf %349, %349 : vector<8x32xf32>
    %cst_137 = arith.constant dense<0.000000e+00> : vector<8xf32>
    %351 = vector.multi_reduction <add>, %350, %cst_137 [1] : vector<8x32xf32> to vector<8xf32>
    %352 = vector.shape_cast %351 : vector<8xf32> to vector<8x1xf32>
    %cst_138 = arith.constant 3.200000e+01 : f32
    %353 = vector.broadcast %cst_138 : f32 to vector<8x1xf32>
    %354 = arith.divf %352, %353 : vector<8x1xf32>
    %355 = vector.broadcast %347 : vector<8x1xf32> to vector<8x32xf32>
    %356 = arith.subf %341, %355 : vector<8x32xf32>
    %cst_139 = arith.constant 9.99999974E-6 : f32
    %357 = vector.broadcast %cst_139 : f32 to vector<8x1xf32>
    %358 = arith.addf %354, %357 : vector<8x1xf32>
    %359 = math.rsqrt %358 : vector<8x1xf32>
    %360 = vector.broadcast %359 : vector<8x1xf32> to vector<8x32xf32>
    %361 = arith.mulf %356, %360 : vector<8x32xf32>
    %362 = vector.broadcast %342 : vector<1x32xf32> to vector<8x32xf32>
    %363 = arith.mulf %361, %362 : vector<8x32xf32>
    %364 = vector.broadcast %343 : vector<1x32xf32> to vector<8x32xf32>
    %365 = arith.addf %363, %364 : vector<8x32xf32>
    %c1_140 = arith.constant 1 : index
    %c0_141 = arith.constant 0 : index
    %c0_142 = arith.constant 0 : index
    %366 = vector.load %arg9[%c1_140, %c0_141, %c0_142] : memref<2x32x128xf32, #tpu.memory_space<vmem>>, vector<1x32x128xf32>
    %367 = vector.shape_cast %366 : vector<1x32x128xf32> to vector<32x128xf32>
    %cst_143 = arith.constant dense<0.000000e+00> : vector<8x128xf32>
    %368 = tpu.matmul %365, %367, %cst_143 {dimension_numbers = #tpu.dot_dimension_numbers<[1], [0], [0], [1], [0, 0, 1, 1], [], []>} : vector<8x32xf32>, vector<32x128xf32>, vector<8x128xf32> -> vector<8x128xf32>
    %c22 = arith.constant 22 : index
    %c0_144 = arith.constant 0 : index
    %369 = vector.load %arg5[%c22, %c0_144] : memref<26x256xf32, #tpu.memory_space<vmem>>, vector<1x128xf32>
    %370 = vector.broadcast %369 : vector<1x128xf32> to vector<8x128xf32>
    %371 = arith.addf %368, %370 : vector<8x128xf32>
    %cst_145 = arith.constant 5.000000e-01 : f32
    %372 = vector.broadcast %cst_145 : f32 to vector<8x128xf32>
    %373 = arith.mulf %372, %371 : vector<8x128xf32>
    %cst_146 = arith.constant 0.707106769 : f32
    %374 = vector.broadcast %cst_146 : f32 to vector<8x128xf32>
    %375 = arith.mulf %371, %374 : vector<8x128xf32>
    %376 = math.absf %375 : vector<8x128xf32>
    %cst_147 = arith.constant 0.327591091 : f32
    %377 = vector.broadcast %cst_147 : f32 to vector<8x128xf32>
    %378 = arith.mulf %377, %376 : vector<8x128xf32>
    %cst_148 = arith.constant 1.000000e+00 : f32
    %379 = vector.broadcast %cst_148 : f32 to vector<8x128xf32>
    %380 = arith.addf %379, %378 : vector<8x128xf32>
    %cst_149 = arith.constant 1.000000e+00 : f32
    %381 = vector.broadcast %cst_149 : f32 to vector<8x128xf32>
    %382 = arith.divf %381, %380 : vector<8x128xf32>
    %cst_150 = arith.constant 1.06140542 : f32
    %383 = vector.broadcast %cst_150 : f32 to vector<8x128xf32>
    %384 = arith.mulf %383, %382 : vector<8x128xf32>
    %cst_151 = arith.constant 1.45315206 : f32
    %385 = vector.broadcast %cst_151 : f32 to vector<8x128xf32>
    %386 = arith.subf %384, %385 : vector<8x128xf32>
    %387 = arith.mulf %386, %382 : vector<8x128xf32>
    %cst_152 = arith.constant 1.42141378 : f32
    %388 = vector.broadcast %cst_152 : f32 to vector<8x128xf32>
    %389 = arith.addf %387, %388 : vector<8x128xf32>
    %390 = arith.mulf %389, %382 : vector<8x128xf32>
    %cst_153 = arith.constant 0.284496725 : f32
    %391 = vector.broadcast %cst_153 : f32 to vector<8x128xf32>
    %392 = arith.subf %390, %391 : vector<8x128xf32>
    %393 = arith.mulf %392, %382 : vector<8x128xf32>
    %cst_154 = arith.constant 0.254829586 : f32
    %394 = vector.broadcast %cst_154 : f32 to vector<8x128xf32>
    %395 = arith.addf %393, %394 : vector<8x128xf32>
    %396 = arith.mulf %395, %382 : vector<8x128xf32>
    %cst_155 = arith.constant 0.000000e+00 : f32
    %397 = vector.broadcast %cst_155 : f32 to vector<8x128xf32>
    %398 = arith.subf %397, %376 : vector<8x128xf32>
    %399 = arith.mulf %398, %376 : vector<8x128xf32>
    %400 = math.exp %399 : vector<8x128xf32>
    %401 = arith.mulf %396, %400 : vector<8x128xf32>
    %cst_156 = arith.constant 1.000000e+00 : f32
    %402 = vector.broadcast %cst_156 : f32 to vector<8x128xf32>
    %403 = arith.subf %402, %401 : vector<8x128xf32>
    %cst_157 = arith.constant 0.000000e+00 : f32
    %404 = vector.broadcast %cst_157 : f32 to vector<8x128xf32>
    %405 = arith.cmpf olt, %375, %404 : vector<8x128xf32>
    %cst_158 = arith.constant 0.000000e+00 : f32
    %406 = vector.broadcast %cst_158 : f32 to vector<8x128xf32>
    %407 = arith.subf %406, %403 : vector<8x128xf32>
    %408 = arith.select %405, %407, %403 : vector<8x128xi1>, vector<8x128xf32>
    %cst_159 = arith.constant 1.000000e+00 : f32
    %409 = vector.broadcast %cst_159 : f32 to vector<8x128xf32>
    %410 = arith.addf %409, %408 : vector<8x128xf32>
    %411 = arith.mulf %373, %410 : vector<8x128xf32>
    %c1_160 = arith.constant 1 : index
    %c0_161 = arith.constant 0 : index
    %c0_162 = arith.constant 0 : index
    %412 = vector.load %arg10[%c1_160, %c0_161, %c0_162] : memref<2x128x32xf32, #tpu.memory_space<vmem>>, vector<1x128x32xf32>
    %413 = vector.shape_cast %412 : vector<1x128x32xf32> to vector<128x32xf32>
    %cst_163 = arith.constant dense<0.000000e+00> : vector<8x32xf32>
    %414 = tpu.matmul %411, %413, %cst_163 {dimension_numbers = #tpu.dot_dimension_numbers<[1], [0], [0], [1], [0, 0, 1, 1], [], []>} : vector<8x128xf32>, vector<128x32xf32>, vector<8x32xf32> -> vector<8x32xf32>
    %c23 = arith.constant 23 : index
    %c0_164 = arith.constant 0 : index
    %415 = vector.load %arg5[%c23, %c0_164] : memref<26x256xf32, #tpu.memory_space<vmem>>, vector<1x32xf32>
    %416 = vector.broadcast %415 : vector<1x32xf32> to vector<8x32xf32>
    %417 = arith.addf %414, %416 : vector<8x32xf32>
    %418 = arith.addf %365, %417 : vector<8x32xf32>
    %c24 = arith.constant 24 : index
    %c0_165 = arith.constant 0 : index
    %419 = vector.load %arg5[%c24, %c0_165] : memref<26x256xf32, #tpu.memory_space<vmem>>, vector<1x32xf32>
    %c25 = arith.constant 25 : index
    %c0_166 = arith.constant 0 : index
    %420 = vector.load %arg5[%c25, %c0_166] : memref<26x256xf32, #tpu.memory_space<vmem>>, vector<1x32xf32>
    %cst_167 = arith.constant dense<0.000000e+00> : vector<8xf32>
    %421 = vector.multi_reduction <add>, %418, %cst_167 [1] : vector<8x32xf32> to vector<8xf32>
    %422 = vector.shape_cast %421 : vector<8xf32> to vector<8x1xf32>
    %cst_168 = arith.constant 3.200000e+01 : f32
    %423 = vector.broadcast %cst_168 : f32 to vector<8x1xf32>
    %424 = arith.divf %422, %423 : vector<8x1xf32>
    %425 = vector.broadcast %424 : vector<8x1xf32> to vector<8x32xf32>
    %426 = arith.subf %418, %425 : vector<8x32xf32>
    %427 = arith.mulf %426, %426 : vector<8x32xf32>
    %cst_169 = arith.constant dense<0.000000e+00> : vector<8xf32>
    %428 = vector.multi_reduction <add>, %427, %cst_169 [1] : vector<8x32xf32> to vector<8xf32>
    %429 = vector.shape_cast %428 : vector<8xf32> to vector<8x1xf32>
    %cst_170 = arith.constant 3.200000e+01 : f32
    %430 = vector.broadcast %cst_170 : f32 to vector<8x1xf32>
    %431 = arith.divf %429, %430 : vector<8x1xf32>
    %432 = vector.broadcast %424 : vector<8x1xf32> to vector<8x32xf32>
    %433 = arith.subf %418, %432 : vector<8x32xf32>
    %cst_171 = arith.constant 9.99999974E-6 : f32
    %434 = vector.broadcast %cst_171 : f32 to vector<8x1xf32>
    %435 = arith.addf %431, %434 : vector<8x1xf32>
    %436 = math.rsqrt %435 : vector<8x1xf32>
    %437 = vector.broadcast %436 : vector<8x1xf32> to vector<8x32xf32>
    %438 = arith.mulf %433, %437 : vector<8x32xf32>
    %439 = vector.broadcast %419 : vector<1x32xf32> to vector<8x32xf32>
    %440 = arith.mulf %438, %439 : vector<8x32xf32>
    %441 = vector.broadcast %420 : vector<1x32xf32> to vector<8x32xf32>
    %442 = arith.addf %440, %441 : vector<8x32xf32>
    %c6 = arith.constant 6 : index
    %c0_172 = arith.constant 0 : index
    %443 = vector.load %arg5[%c6, %c0_172] : memref<26x256xf32, #tpu.memory_space<vmem>>, vector<1x32xf32>
    %c7 = arith.constant 7 : index
    %c0_173 = arith.constant 0 : index
    %444 = vector.load %arg5[%c7, %c0_173] : memref<26x256xf32, #tpu.memory_space<vmem>>, vector<1x32xf32>
    %cst_174 = arith.constant dense<0.000000e+00> : vector<8xf32>
    %445 = vector.multi_reduction <add>, %442, %cst_174 [1] : vector<8x32xf32> to vector<8xf32>
    %446 = vector.shape_cast %445 : vector<8xf32> to vector<8x1xf32>
    %cst_175 = arith.constant 3.200000e+01 : f32
    %447 = vector.broadcast %cst_175 : f32 to vector<8x1xf32>
    %448 = arith.divf %446, %447 : vector<8x1xf32>
    %449 = vector.broadcast %448 : vector<8x1xf32> to vector<8x32xf32>
    %450 = arith.subf %442, %449 : vector<8x32xf32>
    %451 = arith.mulf %450, %450 : vector<8x32xf32>
    %cst_176 = arith.constant dense<0.000000e+00> : vector<8xf32>
    %452 = vector.multi_reduction <add>, %451, %cst_176 [1] : vector<8x32xf32> to vector<8xf32>
    %453 = vector.shape_cast %452 : vector<8xf32> to vector<8x1xf32>
    %cst_177 = arith.constant 3.200000e+01 : f32
    %454 = vector.broadcast %cst_177 : f32 to vector<8x1xf32>
    %455 = arith.divf %453, %454 : vector<8x1xf32>
    %456 = vector.broadcast %448 : vector<8x1xf32> to vector<8x32xf32>
    %457 = arith.subf %442, %456 : vector<8x32xf32>
    %cst_178 = arith.constant 9.99999974E-6 : f32
    %458 = vector.broadcast %cst_178 : f32 to vector<8x1xf32>
    %459 = arith.addf %455, %458 : vector<8x1xf32>
    %460 = math.rsqrt %459 : vector<8x1xf32>
    %461 = vector.broadcast %460 : vector<8x1xf32> to vector<8x32xf32>
    %462 = arith.mulf %457, %461 : vector<8x32xf32>
    %463 = vector.broadcast %443 : vector<1x32xf32> to vector<8x32xf32>
    %464 = arith.mulf %462, %463 : vector<8x32xf32>
    %465 = vector.broadcast %444 : vector<1x32xf32> to vector<8x32xf32>
    %466 = arith.addf %464, %465 : vector<8x32xf32>
    %c0_179 = arith.constant 0 : index
    %c0_180 = arith.constant 0 : index
    %467 = vector.load %arg11[%c0_179, %c0_180] : memref<32x128xf32, #tpu.memory_space<vmem>>, vector<32x128xf32>
    %cst_181 = arith.constant dense<0.000000e+00> : vector<8x128xf32>
    %468 = tpu.matmul %466, %467, %cst_181 {dimension_numbers = #tpu.dot_dimension_numbers<[1], [0], [0], [1], [0, 0, 1, 1], [], []>} : vector<8x32xf32>, vector<32x128xf32>, vector<8x128xf32> -> vector<8x128xf32>
    %c8 = arith.constant 8 : index
    %c0_182 = arith.constant 0 : index
    %469 = vector.load %arg5[%c8, %c0_182] : memref<26x256xf32, #tpu.memory_space<vmem>>, vector<1x128xf32>
    %470 = vector.broadcast %469 : vector<1x128xf32> to vector<8x128xf32>
    %471 = arith.addf %468, %470 : vector<8x128xf32>
    %472 = vector.extract_strided_slice %471 {offsets = [0, 0], sizes = [8, 64], strides = [1, 1]} : vector<8x128xf32> to vector<8x64xf32>
    %c0_183 = arith.constant 0 : index
    %c0_184 = arith.constant 0 : index
    %473 = vector.load %arg13[%c0_183, %c0_184] : memref<8x64xf32, #tpu.memory_space<vmem>>, vector<8x64xf32>
    tpu.vector_store %arg13[%c0_183, %c0_184], %472 {strides = array<i32>} : memref<8x64xf32, #tpu.memory_space<vmem>>, vector<8x64xf32>,
    %474 = vector.extract_strided_slice %471 {offsets = [0, 64], sizes = [8, 32], strides = [1, 1]} : vector<8x128xf32> to vector<8x32xf32>
    %cst_185 = arith.constant 0.000000e+00 : f32
    %475 = vector.broadcast %cst_185 : f32 to vector<8x32xf32>
    %476 = arith.maximumf %474, %475 : vector<8x32xf32>
    %c0_186 = arith.constant 0 : index
    %c0_187 = arith.constant 0 : index
    %477 = vector.load %arg12[%c0_186, %c0_187] : memref<32x160xf32, #tpu.memory_space<vmem>>, vector<32x160xf32>
    %cst_188 = arith.constant dense<0.000000e+00> : vector<8x160xf32>
    %478 = tpu.matmul %476, %477, %cst_188 {dimension_numbers = #tpu.dot_dimension_numbers<[1], [0], [0], [1], [0, 0, 1, 1], [], []>} : vector<8x32xf32>, vector<32x160xf32>, vector<8x160xf32> -> vector<8x160xf32>
    %c9 = arith.constant 9 : index
    %c0_189 = arith.constant 0 : index
    %479 = vector.load %arg5[%c9, %c0_189] : memref<26x256xf32, #tpu.memory_space<vmem>>, vector<1x160xf32>
    %480 = vector.broadcast %479 : vector<1x160xf32> to vector<8x160xf32>
    %481 = arith.addf %478, %480 : vector<8x160xf32>
    %c0_190 = arith.constant 0 : index
    %c0_191 = arith.constant 0 : index
    %482 = vector.load %arg14[%c0_190, %c0_191] : memref<8x160xf32, #tpu.memory_space<vmem>>, vector<8x160xf32>
    tpu.vector_store %arg14[%c0_190, %c0_191], %481 {strides = array<i32>} : memref<8x160xf32, #tpu.memory_space<vmem>>, vector<8x160xf32>,
    return
  }
  func.func @transform_0(%arg0: i32) -> (i32, i32) {
    %c0_i32 = arith.constant 0 : i32
    %c0_i32_0 = arith.constant 0 : i32
    return %arg0, %c0_i32 : i32, i32
  }
  func.func @transform_1(%arg0: i32) -> (i32, i32) {
    %c0_i32 = arith.constant 0 : i32
    %c0_i32_0 = arith.constant 0 : i32
    %c0_i32_1 = arith.constant 0 : i32
    return %c0_i32, %c0_i32_0 : i32, i32
  }
  func.func @transform_2(%arg0: i32) -> (i32, i32) {
    %c0_i32 = arith.constant 0 : i32
    %c0_i32_0 = arith.constant 0 : i32
    %c0_i32_1 = arith.constant 0 : i32
    return %c0_i32, %c0_i32_0 : i32, i32
  }
  func.func @transform_3(%arg0: i32) -> (i32, i32) {
    %c0_i32 = arith.constant 0 : i32
    %c0_i32_0 = arith.constant 0 : i32
    %c0_i32_1 = arith.constant 0 : i32
    return %c0_i32, %c0_i32_0 : i32, i32
  }
  func.func @transform_4(%arg0: i32) -> (i32, i32) {
    %c0_i32 = arith.constant 0 : i32
    %c0_i32_0 = arith.constant 0 : i32
    %c0_i32_1 = arith.constant 0 : i32
    return %c0_i32, %c0_i32_0 : i32, i32
  }
  func.func @transform_5(%arg0: i32) -> (i32, i32) {
    %c0_i32 = arith.constant 0 : i32
    %c0_i32_0 = arith.constant 0 : i32
    %c0_i32_1 = arith.constant 0 : i32
    return %c0_i32, %c0_i32_0 : i32, i32
  }
  func.func @transform_6(%arg0: i32) -> (i32, i32, i32) {
    %c0_i32 = arith.constant 0 : i32
    %c0_i32_0 = arith.constant 0 : i32
    %c0_i32_1 = arith.constant 0 : i32
    %c0_i32_2 = arith.constant 0 : i32
    return %c0_i32, %c0_i32_0, %c0_i32_1 : i32, i32, i32
  }
  func.func @transform_7(%arg0: i32) -> (i32, i32, i32) {
    %c0_i32 = arith.constant 0 : i32
    %c0_i32_0 = arith.constant 0 : i32
    %c0_i32_1 = arith.constant 0 : i32
    %c0_i32_2 = arith.constant 0 : i32
    return %c0_i32, %c0_i32_0, %c0_i32_1 : i32, i32, i32
  }
  func.func @transform_8(%arg0: i32) -> (i32, i32, i32) {
    %c0_i32 = arith.constant 0 : i32
    %c0_i32_0 = arith.constant 0 : i32
    %c0_i32_1 = arith.constant 0 : i32
    %c0_i32_2 = arith.constant 0 : i32
    return %c0_i32, %c0_i32_0, %c0_i32_1 : i32, i32, i32
  }
  func.func @transform_9(%arg0: i32) -> (i32, i32, i32) {
    %c0_i32 = arith.constant 0 : i32
    %c0_i32_0 = arith.constant 0 : i32
    %c0_i32_1 = arith.constant 0 : i32
    %c0_i32_2 = arith.constant 0 : i32
    return %c0_i32, %c0_i32_0, %c0_i32_1 : i32, i32, i32
  }
  func.func @transform_10(%arg0: i32) -> (i32, i32) {
    %c0_i32 = arith.constant 0 : i32
    %c0_i32_0 = arith.constant 0 : i32
    %c0_i32_1 = arith.constant 0 : i32
    return %c0_i32, %c0_i32_0 : i32, i32
  }
  func.func @transform_11(%arg0: i32) -> (i32, i32) {
    %c0_i32 = arith.constant 0 : i32
    %c0_i32_0 = arith.constant 0 : i32
    %c0_i32_1 = arith.constant 0 : i32
    return %c0_i32, %c0_i32_0 : i32, i32
  }
  func.func @transform_12(%arg0: i32) -> (i32, i32) {
    %c0_i32 = arith.constant 0 : i32
    %c0_i32_0 = arith.constant 0 : i32
    return %arg0, %c0_i32 : i32, i32
  }
  func.func @transform_13(%arg0: i32) -> (i32, i32) {
    %c0_i32 = arith.constant 0 : i32
    %c0_i32_0 = arith.constant 0 : i32
    return %arg0, %c0_i32 : i32, i32
  }
}

</mosaic_0001>

<bundles_post_ra>
// kernel: tile.22
= control target key start
LH: loop header
LB: loop body
LE: loop exit
PB: predicated region body
PF: predicated region fallthrough
CT: control target
= control target key end

     0   :  { %s28_s0 = inlined_call_operand.vmem [shape: f32[4], index: 0, kind: input, shape index: {}]   ;;  %s29_s1 = inlined_call_operand.vmem [shape: f32[16,4], index: 1, kind: output, shape index: {}]  }
   0x1   :  { %v4_v0 = vld [vmem:[%s28_s0] ss:$0 sm:$0xff] }
   0x2   :  { %5 = vst [vmem:[%s29_s1] sm:$0xff] %v4_v0  ;;  %8 = vst [vmem:[%s29_s1 + $0x8] sm:$0xff] %v4_v0 }

// kernel: tile.23
= control target key start
LH: loop header
LB: loop body
LE: loop exit
PB: predicated region body
PF: predicated region fallthrough
CT: control target
= control target key end

     0   :  { %s131_s10 = smov 60   ;;  %s132_s11 = smov 52   ;;  %vm3_vm0 = vcmask 31744   ;;  %vm9_vm1 = vcmask 523744   ;;  %vm15_vm2 = vcmask 490944   ;;  %vm21_vm3 = vcmask 458144   ;;  %s207_s0 = inlined_call_operand.vmem [shape: f32[16,4], index: 0, kind: input, shape index: {}]   ;;  %s208_s1 = inlined_call_operand.vmem [shape: f32[64], index: 1, kind: output, shape index: {}]  }
   0x1   :  { %v101_v0 = vld [vmem:[%s207_s0 + $0xf] sm:$0x1]   ;;  %v103_v1 = vld [vmem:[%s207_s0 + $0xd] sm:$0x1]   ;;  %v102_v2 = vld [vmem:[%s207_s0 + $0xe] sm:$0x1]  }
   0x2   :  { %7 = vrot.lane.b32.xlu0 %v101_v0, %s131_s10  ;;  %19 = vrot.lane.b32.xlu1 %v103_v1, %s132_s11  ;;  %v104_v3 = vld [vmem:[%s207_s0 + $0xc] sm:$0x1]   ;;  %s133_s16 = smov 56   ;;  %s134_s17 = smov 48   ;;  %v105_v4 = vld [vmem:[%s207_s0 + $0xb] sm:$0x1]  }
   0x3   :  { %v106_v5 = vld [vmem:[%s207_s0 + $0xa] sm:$0x1]   ;;  %v2_v6 = vld [vmem:[%s207_s0] sm:$0x1]   ;;  %s135_s24 = smov 44   ;;  %s136_s25 = smov 40  }
   0x4   :  { %4 = vst.msk [vmem:[#allocation0] sm:$0x1] %vm3_vm0, %v2_v6   ;;  %v107_v7 = vld [vmem:[%s207_s0 + $0x9] sm:$0x1]   ;;  %v108_v8 = vld [vmem:[%s207_s0 + $0x8] sm:$0x1]  }
   0x5   :  { %s137_s30 = smov 36   ;;  %s138_s2 = smov 32   ;;  %v109_v9 = vld [vmem:[%s207_s0 + $0x7] sm:$0x1]   ;;  %v110_v10 = vld [vmem:[%s207_s0 + $0x6] sm:$0x1]  }
   0x6   :  { %13 = vrot.lane.b32.xlu0 %v102_v2, %s133_s16  ;;  %25 = vrot.lane.b32.xlu1 %v104_v3, %s134_s17  ;;  %s139_s7 = smov 28   ;;  %s140_s8 = smov 24   ;;  %v111_v11 = vld [vmem:[%s207_s0 + $0x5] sm:$0x1]   ;;  %v112_v12 = vld [vmem:[%s207_s0 + $0x4] sm:$0x1]  }
   0x7   :  { %s141_s13 = smov 20   ;;  %s142_s14 = smov 16   ;;  %v113_v13 = vld [vmem:[%s207_s0 + $0x3] sm:$0x1]   ;;  %v114_v14 = vld [vmem:[%s207_s0 + $0x2] sm:$0x1]  }
   0x8   :  { %s143_s19 = smov 12   ;;  %s144_s20 = smov 8   ;;  %v115_v15 = vld [vmem:[%s207_s0 + $0x1] sm:$0x1]   ;;  %vm27_vm4 = vcmask 425344   ;;  %vm33_vm5 = vcmask 392544  }
   0x9   :  { %s145_s0 = smov 4   ;;  %vm39_vm6 = vcmask 359744   ;;  %vm45_vm7 = vcmask 326944   ;;  %vm51_vm8 = vcmask 294144   ;;  %vm57_vm9 = vcmask 261344  }
   0xa   :  { %31 = vrot.lane.b32.xlu0 %v105_v4, %s135_s24  ;;  %37 = vrot.lane.b32.xlu1 %v106_v5, %s136_s25  ;;  %vm63_vm10 = vcmask 228544   ;;  %vm69_vm11 = vcmask 195744   ;;  %vm75_vm12 = vcmask 162944   ;;  %vm81_vm13 = vcmask 130144  }
   0xb   :  { %vm87_vm14 = vcmask 97344   ;;  %vm93_vm15 = vcmask 64544  }
   0xe   :  { %43 = vrot.lane.b32.xlu0 %v107_v7, %s137_s30  ;;  %49 = vrot.lane.b32.xlu1 %v108_v8, %s138_s2 }
  0x12   :  { %55 = vrot.lane.b32.xlu0 %v109_v9, %s139_s7  ;;  %61 = vrot.lane.b32.xlu1 %v110_v10, %s140_s8 }
  0x16   :  { %67 = vrot.lane.b32.xlu0 %v111_v11, %s141_s13  ;;  %73 = vrot.lane.b32.xlu1 %v112_v12, %s142_s14 }
  0x1a   :  { %79 = vrot.lane.b32.xlu0 %v113_v13, %s143_s19  ;;  %85 = vrot.lane.b32.xlu1 %v114_v14, %s144_s20 }
  0x1e   :  { %91 = vrot.lane.b32.xlu0 %v115_v15, %s145_s0 }
  0x74   :  { %v8_v16 = vpop.permute.xlu0 %7   ;;  %v20_v17 = vpop.permute.xlu1 %19  }
  0x75   :  { %10 = vst.msk [vmem:[#allocation0] sm:$0x1] %vm9_vm1, %v8_v16  }
  0x78   :  { %v14_v18 = vpop.permute.xlu0 %13   ;;  %v26_v19 = vpop.permute.xlu1 %25  }
  0x79   :  { %16 = vst.msk [vmem:[#allocation0] sm:$0x1] %vm15_vm2, %v14_v18  }
  0x7a   :  { %22 = vst.msk [vmem:[#allocation0] sm:$0x1] %vm21_vm3, %v20_v17  }
  0x7b   :  { %28 = vst.msk [vmem:[#allocation0] sm:$0x1] %vm27_vm4, %v26_v19  }
  0x7c   :  { %v32_v20 = vpop.permute.xlu0 %31   ;;  %v38_v21 = vpop.permute.xlu1 %37  }
  0x7d   :  { %34 = vst.msk [vmem:[#allocation0] sm:$0x1] %vm33_vm5, %v32_v20  }
  0x7e   :  { %40 = vst.msk [vmem:[#allocation0] sm:$0x1] %vm39_vm6, %v38_v21  }
  0x80   :  { %v44_v22 = vpop.permute.xlu0 %43   ;;  %v50_v23 = vpop.permute.xlu1 %49  }
  0x81   :  { %46 = vst.msk [vmem:[#allocation0] sm:$0x1] %vm45_vm7, %v44_v22  }
  0x82   :  { %52 = vst.msk [vmem:[#allocation0] sm:$0x1] %vm51_vm8, %v50_v23  }
  0x84   :  { %v56_v24 = vpop.permute.xlu0 %55   ;;  %v62_v25 = vpop.permute.xlu1 %61  }
  0x85   :  { %58 = vst.msk [vmem:[#allocation0] sm:$0x1] %vm57_vm9, %v56_v24  }
  0x86   :  { %64 = vst.msk [vmem:[#allocation0] sm:$0x1] %vm63_vm10, %v62_v25  }
  0x88   :  { %v68_v26 = vpop.permute.xlu0 %67   ;;  %v74_v27 = vpop.permute.xlu1 %73  }
  0x89   :  { %70 = vst.msk [vmem:[#allocation0] sm:$0x1] %vm69_vm11, %v68_v26  }
  0x8a   :  { %76 = vst.msk [vmem:[#allocation0] sm:$0x1] %vm75_vm12, %v74_v27  }
  0x8c   :  { %v80_v28 = vpop.permute.xlu0 %79   ;;  %v86_v29 = vpop.permute.xlu1 %85  }
  0x8d   :  { %82 = vst.msk [vmem:[#allocation0] sm:$0x1] %vm81_vm13, %v80_v28  }
  0x8e   :  { %88 = vst.msk [vmem:[#allocation0] sm:$0x1] %vm87_vm14, %v86_v29  }
  0x90   :  { %v92_v30 = vpop.permute.xlu0 %91  }
  0x91   :  { %94 = vst.msk [vmem:[#allocation0] sm:$0x1] %vm93_vm15, %v92_v30  }
  0x98   :  { %v98_v31 = vld [vmem:[#allocation0] sm:$0x1] }
  0x99   :  { %100 = vst [vmem:[%s208_s1] sm:$0x1] %v98_v31 }

// kernel: squeeze.1
= control target key start
LH: loop header
LB: loop body
LE: loop exit
PB: predicated region body
PF: predicated region fallthrough
CT: control target
= control target key end

     0   :  { %s37_s8 = smov 80   ;;  %vm7_vm0 = vcmask 130048   ;;  %s38_s9 = smov 96   ;;  %s55_s0 = inlined_call_operand.vmem [shape: f32[64], index: 0, kind: input, shape index: {}]   ;;  %s56_s1 = inlined_call_operand.vmem [shape: f32[4,16], index: 1, kind: output, shape index: {}]  }
   0x1   :  { %v4_v0 = vld [vmem:[%s55_s0] sm:$0x1]  ;;  %s36_s0 = smov 112  }
   0x2   :  { %5 = vst [vmem:[#allocation1] sm:$0x1] %v4_v0 }
   0x9   :  { %v9_v1 = vld [vmem:[#allocation1] sm:$0x1]  }
   0xa   :  { %v21_v2 = vld [vmem:[#allocation1] sm:$0x1]   ;;  %10 = vrot.lane.b32.xlu0 %v9_v1, %s36_s0 }
   0xb   :  { %22 = vrot.lane.b32.xlu1 %v21_v2, %s37_s8  ;;  %v6_v3 = vld [vmem:[#allocation1] sm:$0x1]  }
   0xc   :  { %v15_v4 = vld [vmem:[#allocation1] sm:$0x1]   ;;  %8 = vst.msk [vmem:[#allocation0] sm:$0x1] %vm7_vm0, %v6_v3  }
   0xe   :  { %16 = vrot.lane.b32.xlu0 %v15_v4, %s38_s9 }
  0x7c   :  { %v11_v5 = vpop.permute.xlu0 %10  }
  0x7d   :  { %v23_v6 = vpop.permute.xlu1 %22   ;;  %14 = vst.msk [vmem:[#allocation0 + $0x1] sm:$0x1] %vm7_vm0, %v11_v5  }
  0x7e   :  { %26 = vst.msk [vmem:[#allocation0 + $0x3] sm:$0x1] %vm7_vm0, %v23_v6  }
  0x80   :  { %v17_v7 = vpop.permute.xlu0 %16  }
  0x81   :  { %20 = vst.msk [vmem:[#allocation0 + $0x2] sm:$0x1] %vm7_vm0, %v17_v7  }
  0x88   :  { %v30_v8 = vld [vmem:[#allocation0] sm:$0xf] }
  0x89   :  { %32 = vst [vmem:[%s56_s1] sm:$0xf] %v30_v8 }

// kernel: contad_forward.1
= control target key start
LH: loop header
LB: loop body
LE: loop exit
PB: predicated region body
PF: predicated region fallthrough
CT: control target
= control target key end

     0   :  { %vm54_vm0 = vcmask 64512   ;;  %v3556_v2 = vmov 0.0   ;;  %vm3557_vm1 = vmmov 0   ;;  %v3558_v6 = vmov 0.0|0.0   ;;  %s4288_s0 = inlined_call_operand.vmem [shape: f32[8,64], index: 0, kind: input, shape index: {}]   ;;  %s4289_s1 = inlined_call_operand.vmem [shape: f32[64,64], index: 1, kind: input, shape index: {}]   ;;  %s4290_s2 = inlined_call_operand.vmem [shape: f32[8,8], index: 2, kind: input, shape index: {}]   ;;  %s4291_s3 = inlined_call_operand.vmem [shape: f32[8,64], index: 3, kind: input, shape index: {}]   ;;  %s4292_s4 = inlined_call_operand.vmem [shape: f32[26,256], index: 4, kind: input, shape index: {}]   ;;  %s4293_s5 = inlined_call_operand.vmem [shape: f32[64,32], index: 5, kind: input, shape index: {}]   ;;  %s4294_s6 = inlined_call_operand.vmem [shape: f32[2,32,128], index: 6, kind: input, shape index: {}]   ;;  %s4295_s7 = inlined_call_operand.vmem [shape: f32[2,32,32], index: 7, kind: input, shape index: {}]   ;;  %s4296_s8 = inlined_call_operand.vmem [shape: f32[2,32,128], index: 8, kind: input, shape index: {}]   ;;  %s4297_s9 = inlined_call_operand.vmem [shape: f32[2,128,32], index: 9, kind: input, shape index: {}]   ;;  %s4298_s10 = inlined_call_operand.vmem [shape: f32[32,128], index: 10, kind: input, shape index: {}]   ;;  %s4299_s11 = inlined_call_operand.vmem [shape: f32[32,160], index: 11, kind: input, shape index: {}]   ;;  %s4300_s12 = inlined_call_operand.hbm [shape: f32[8,64], index: 12, kind: output, shape index: {0}]   ;;  %s4301_s13 = inlined_call_operand.vmem [shape: f32[8,160], index: 13, kind: output, shape index: {1}]  }
   0x1   :  { %v44_v0 = vld [vmem:[%s4288_s0] sm:$0xff]  ;;  %3030 = vmatprep.subr.mxu0 %v3556_v2  ;;  %3032 = vmatprep.mubr.msk.f32.mxu0 %vm3557_vm1, %v3556_v2  ;;  %v46_v4 = vld [vmem:[%s4289_s1 + $0x8] sm:$0xff]  ;;  %v47_v5 = vld [vmem:[%s4289_s1 + $0x10] sm:$0xff] }
   0x2   :  { %v3650_v1 = vld [vmem:[%s4290_s2] sm:$0xff]  ;;  %3031 = vmatpush3.msra.mxu0 %v44_v0  ;;  %3324 = vmatprep.subr.bf16.mxu1 %v3558_v6  ;;  %v48_v8 = vld [vmem:[%s4289_s1 + $0x18] sm:$0xff] }
   0x3   :  { %v45_v3 = vld [vmem:[%s4289_s1] sm:$0xff]  ;;  %3033 = vmatmul.mubr.msk.f32.vlgmr.msra.gmra.mrb[0].mxu0 %vm54_vm0, %v3650_v1  ;;  %3051 = vmatprep.mubr.msk.f32.mxu1 %vm3557_vm1, %v3556_v2 }
   0x4   :  { %v3325_v7 = vpack.c.bf16 %v46_v4, %v45_v3 }
   0x5   :  { %19 = vsyncpa [#allocation3], 0  ;;  %v3328_v9 = vpack.c.bf16 %v48_v8, %v47_v5  ;;  %3054 = vmatprep.subr.mxu0 %v3556_v2  ;;  %v49_v10 = vld [vmem:[%s4289_s1 + $0x20] sm:$0xff]  ;;  %v50_v11 = vld [vmem:[%s4289_s1 + $0x28] sm:$0xff]  ;;  %3056 = vmatprep.mubr.msk.f32.mxu0 %vm3557_vm1, %v3556_v2  ;;  %vm128_vm2 = vcmask 523264   ;;  %vm455_vm3 = vcmask 261120  }
   0x6   :  { %3326 = vmatpush3.bf16.msra.mxu1 %v3325_v7  ;;  %v3331_v12 = vpack.c.bf16 %v50_v11, %v49_v10  ;;  %v51_v13 = vld [vmem:[%s4289_s1 + $0x30] sm:$0xff]  ;;  %v52_v14 = vld [vmem:[%s4289_s1 + $0x38] sm:$0xff]  ;;  %v349_v28 = vld [vmem:[%s4292_s4] ss:$0 sm:$0xff]  ;;  %s3559_s23 = smov 88   ;;  %s3560_s24 = smov 96  }
   0x7   :  { %3327 = vmatprep.subr.bf16.mxu1 %v3558_v6  ;;  %v3334_v15 = vpack.c.bf16 %v52_v14, %v51_v13  ;;  %v351_v30 = vld [vmem:[%s4291_s3] sm:$0xff]  ;;  %v372_v40 = vld [vmem:[%s4293_s5 + $0x8] sm:$0xff]  ;;  %v373_v42 = vld [vmem:[%s4293_s5 + $0x10] sm:$0xff]  ;;  %s3561_s25 = smov 120   ;;  %s3562_s1 = smov 112   ;;  %vm1233_vm4 = vcmask 130048  }
   0x8   :  { %v371_v39 = vld [vmem:[%s4293_s5] sm:$0xff]  ;;  %v374_v43 = vld [vmem:[%s4293_s5 + $0x18] sm:$0xff]  ;;  %v376_v46 = vld [vmem:[%s4293_s5 + $0x28] sm:$0xff]  ;;  %s3563_s26 = smov 80   ;;  %s3564_s27 = smov 104   ;;  %vm1235_vm5 = vcmask 195584  }
   0x9   :  { %v3349_v41 = vpack.c.bf16 %v372_v40, %v371_v39  ;;  %v3352_v44 = vpack.c.bf16 %v374_v43, %v373_v42  ;;  %v375_v45 = vld [vmem:[%s4293_s5 + $0x20] sm:$0xff]  ;;  %v377_v48 = vld [vmem:[%s4293_s5 + $0x30] sm:$0xff]  ;;  %v378_v49 = vld [vmem:[%s4293_s5 + $0x38] sm:$0xff]  ;;  %s3565_s5 = smov 72   ;;  %s3566_s28 = smov 64  }
   0xa   :  { %3329 = vmatpush3.bf16.msra.mxu1 %v3328_v9  ;;  %v3355_v47 = vpack.c.bf16 %v376_v46, %v375_v45  ;;  %v3358_v50 = vpack.c.bf16 %v378_v49, %v377_v48  ;;  %v353_v55 = vld [vmem:[%s4292_s4 + $0x1] ss:$0 sm:$0xff]  ;;  %v354_v57 = vld [vmem:[%s4292_s4 + $0x2] ss:$0 sm:$0xff]  ;;  %v379_v60 = vld [vmem:[%s4292_s4 + $0x3] ss:$0 sm:$0xff] }
   0xb   :  { %3330 = vmatprep.subr.bf16.mxu1 %v3558_v6  ;;  %v476_v10 = vld [vmem:[%s4294_s6 + $0x8] sm:$0xff]  ;;  %v478_v13 = vld [vmem:[%s4294_s6 + $0x18] sm:$0xff]  ;;  %s3567_s29 = smov 48   ;;  %s3568_s30 = smov 40  }
   0xc   :  { %s3569_s14 = smov 56   ;;  %s3570_s20 = smov 8  }
   0xd   :  { %s3571_s21 = smov 16   ;;  %s3572_s22 = smov 24  }
   0xe   :  { %3332 = vmatpush3.bf16.msra.mxu1 %v3331_v12 }
   0xf   :  { %3333 = vmatprep.subr.bf16.mxu1 %v3558_v6 }
  0x12   :  { %3335 = vmatpush3.bf16.msra.mxu1 %v3334_v15 }
  0x13   :  { %3348 = vmatprep.subr.bf16.mxu1 %v3558_v6 }
  0xd6   :  { %v124_v16 = vpop.f32.mrb[0].mxu0 }
  0xd7   :  { %v3034_v17 = vpop.f32.mrb[1].mxu0  ;;  %3052 = vmatmul.mubr.msk.f32.vlgmr.msra.gmra.mrb[0].mxu1 %vm128_vm2, %v124_v16 }
  0xd8   :  { %3094 = vmatprep.mubr.msk.f32.mxu1 %vm3557_vm1, %v3556_v2  ;;  %3350 = vmatpush3.bf16.msra.mxu1 %v3349_v41 }
  0xd9   :  { %3351 = vmatprep.subr.bf16.mxu1 %v3558_v6 }
  0xdc   :  { %3353 = vmatpush3.bf16.msra.mxu1 %v3352_v44 }
  0xdd   :  { %3354 = vmatprep.subr.bf16.mxu1 %v3558_v6 }
  0xe0   :  { %3356 = vmatpush3.bf16.msra.mxu1 %v3355_v47 }
  0xe1   :  { %3357 = vmatprep.subr.bf16.mxu1 %v3558_v6 }
  0xe4   :  { %3359 = vmatpush3.bf16.msra.mxu1 %v3358_v50 }
  0xe5   :  { %3360 = vmatprep.subr.bf16.mxu1 %v3558_v6 }
 0x1aa   :  { %v198_v18 = vpop.f32.mrb[0].mxu1 }
 0x1ab   :  { %v202_v19 = vsub.f32 %v44_v0, %v198_v18  ;;  %v3053_v20 = vpop.f32.mrb[1].mxu1 }
 0x1ad   :  { %v203_v21 = vmul.f32 %v202_v19, %v202_v19 }
 0x1af   :  { %3055 = vmatpush3.msra.mxu0 %v203_v21  ;;  %v454_v21 = vld [vmem:[%s4292_s4 + $0x5] ss:$0 sm:$0xff] }
 0x1b0   :  { %3057 = vmatmul.mubr.msk.f32.vlgmr.msra.gmra.mrb[2].mxu0 %vm54_vm0, %v3650_v1  ;;  %3336 = vmatprep.subr.bf16.mxu0 %v3558_v6 }
 0x1b1   :  { %3338 = vmatpush3.bf16.msra.mxu0 %v3325_v7  ;;  %3075 = vmatprep.mubr.msk.f32.mxu0 %vm3557_vm1, %v3556_v2 }
 0x1b2   :  { %3339 = vmatprep.subr.bf16.mxu0 %v3558_v6 }
 0x1b5   :  { %3341 = vmatpush3.bf16.msra.mxu0 %v3328_v9  ;;  %v475_v9 = vld [vmem:[%s4294_s6] sm:$0xff] }
 0x1b6   :  { %3342 = vmatprep.subr.bf16.mxu0 %v3558_v6  ;;  %v3361_v11 = vpack.c.bf16 %v476_v10, %v475_v9 }
 0x1b9   :  { %3344 = vmatpush3.bf16.msra.mxu0 %v3331_v12  ;;  %v477_v12 = vld [vmem:[%s4294_s6 + $0x10] sm:$0xff] }
 0x1ba   :  { %3345 = vmatprep.subr.bf16.mxu0 %v3558_v6  ;;  %v3364_v14 = vpack.c.bf16 %v478_v13, %v477_v12 }
 0x1bd   :  { %3347 = vmatpush3.bf16.msra.mxu0 %v3334_v15 }
 0x1be   :  { %3108 = vmatprep.subr.mxu0 %v3556_v2 }
 0x283   :  { %v270_v22 = vpop.f32.mrb[2].mxu0 }
 0x284   :  { %v3058_v23 = vpop.f32.mrb[3].mxu0  ;;  %3076 = vmatmul.mubr.msk.f32.vlgmr.msra.gmra.mrb[4].mxu0 %vm128_vm2, %v270_v22 }
 0x285   :  { %3110 = vmatprep.mubr.msk.f32.mxu0 %vm3557_vm1, %v3556_v2 }
 0x357   :  { %v343_v24 = vpop.f32.mrb[4].mxu0 }
 0x358   :  { %v344_v25 = vadd.f32 1e-05, %v343_v24  ;;  %v3077_v26 = vpop.f32.mrb[5].mxu0  ;;  %v479_v24 = vld [vmem:[%s4292_s4 + $0x12] ss:$0 sm:$0xff] }
 0x35a   :  { %3476 = vrsqrt.f32 %v344_v25 }
 0x364   :  { %v3477_v27 = vpop.eup %3476 }
 0x365   :  { %v348_v29 = vmul.f32 %v3477_v27, %v202_v19  ;;  %v453_v19 = vld [vmem:[%s4292_s4 + $0x4] ss:$0 sm:$0xff] }
 0x367   :  { %v350_v31 = vmul.f32 %v349_v28, %v348_v29 }
 0x369   :  { %v352_v32 = vadd.f32 %v351_v30, %v350_v31 }
 0x36b   :  { %v355_v33 = vsel %vm128_vm2, %v352_v32, 0.0 }
 0x36c   :  { %356 = vadd.xlane.f32.xlu0 %v355_v33 }
 0x3f9   :  { %v357_v34 = vpop.xlane.xlu0 %356 }
 0x3fa   :  { %v359_v35 = vmul.f32 0.015625, %v357_v34 }
 0x3fc   :  { %v360_v36 = vsub.f32 %v352_v32, %v359_v35  ;;  %v472_v35 = vmul.f32 4.0, %v3650_v1 }
 0x3fe   :  { %v361_v37 = vmul.f32 %v360_v36, %v360_v36 }
 0x400   :  { %v362_v38 = vsel %vm128_vm2, %v361_v37, 0.0 }
 0x401   :  { %363 = vadd.xlane.f32.xlu0 %v362_v38 }
 0x48e   :  { %v364_v51 = vpop.xlane.xlu0 %363 }
 0x48f   :  { %v365_v52 = vmul.f32 0.015625, %v364_v51 }
 0x491   :  { %v366_v53 = vadd.f32 1e-05, %v365_v52 }
 0x493   :  { %3478 = vrsqrt.f32 %v366_v53 }
 0x49d   :  { %v3479_v54 = vpop.eup %3478 }
 0x49e   :  { %v368_v56 = vmul.f32 %v3479_v54, %v360_v36  ;;  %v2832_v36 = vadd.f32 -1.0, %v472_v35 }
 0x4a0   :  { %v369_v58 = vmul.f32 %v368_v56, %v353_v55  ;;  %v3823_v37 = vmul.f32 1e+30, %v2832_v36  ;;  %v1239_v36 = vld [vmem:[%s4295_s7 + $0x10] sm:$0xff] }
 0x4a2   :  { %v370_v59 = vadd.f32 %v369_v58, %v354_v57 }
 0x4a4   :  { %3095 = vmatmul.mubr.msk.f32.vlgmr.msra.gmra.mrb[2].mxu1 %vm128_vm2, %v370_v59 }
 0x4a5   :  { %3105 = vmatprep.mubr.msk.f32.mxu1 %vm3557_vm1, %v3556_v2  ;;  %3362 = vmatpush3.bf16.msra.mxu1 %v3361_v11 }
 0x4a6   :  { %3363 = vmatprep.subr.bf16.mxu1 %v3558_v6 }
 0x4a9   :  { %3365 = vmatpush3.bf16.msra.mxu1 %v3364_v14 }
 0x4aa   :  { %3113 = vmatprep.subr.mxu1 %v3556_v2 }
 0x577   :  { %v449_v61 = vpop.f32.mrb[2].mxu1 }
 0x578   :  { %v450_v62 = vadd.f32 %v449_v61, %v379_v60  ;;  %v3096_v63 = vpop.f32.mrb[3].mxu1 }
 0x57a   :  { %v456_v0 = vsel %vm455_vm3, %v450_v62, 0.0 }
 0x57b   :  { %457 = vadd.xlane.f32.xlu1 %v456_v0 }
 0x608   :  { %v458_v3 = vpop.xlane.xlu1 %457 }
 0x609   :  { %v460_v4 = vmul.f32 0.03125, %v458_v3 }
 0x60b   :  { %v461_v5 = vsub.f32 %v450_v62, %v460_v4 }
 0x60d   :  { %v462_v7 = vmul.f32 %v461_v5, %v461_v5 }
 0x60f   :  { %v463_v8 = vsel %vm455_vm3, %v462_v7, 0.0 }
 0x610   :  { %464 = vadd.xlane.f32.xlu1 %v463_v8 }
 0x69d   :  { %v465_v15 = vpop.xlane.xlu1 %464 }
 0x69e   :  { %v466_v16 = vmul.f32 0.03125, %v465_v15 }
 0x6a0   :  { %v467_v17 = vadd.f32 1e-05, %v466_v16 }
 0x6a2   :  { %3480 = vrsqrt.f32 %v467_v17 }
 0x6ac   :  { %v3481_v18 = vpop.eup %3480 }
 0x6ad   :  { %v469_v20 = vmul.f32 %v3481_v18, %v461_v5 }
 0x6af   :  { %v470_v22 = vmul.f32 %v469_v20, %v453_v19 }
 0x6b1   :  { %v3776_v23 = vadd.f32 %v470_v22, %v454_v21 }
 0x6b3   :  { %3106 = vmatmul.mubr.msk.f32.vlgmr.msra.gmra.mrb[4].mxu1 %vm455_vm3, %v3776_v23 }
 0x6b4   :  { %3115 = vmatprep.mubr.msk.f32.mxu1 %vm3557_vm1, %v3556_v2 }
 0x786   :  { %v549_v25 = vpop.f32.mrb[4].mxu1 }
 0x787   :  { %v3785_v26 = vadd.f32 %v549_v25, %v479_v24  ;;  %v3107_v27 = vpop.f32.mrb[5].mxu1 }
 0x789   :  { %721 = vrot.lane.b32.xlu1 %v3785_v26, %s3559_s23  ;;  %554 = vrot.lane.b32.xlu0 %v3785_v26, %s3560_s24 }
 0x78d   :  { %719 = vrot.lane.b32.xlu1 %v3785_v26, %s3561_s25  ;;  %886 = vrot.lane.b32.xlu0 %v3785_v26, %s3562_s1 }
 0x791   :  { %888 = vrot.lane.b32.xlu1 %v3785_v26, %s3563_s26  ;;  %1053 = vrot.lane.b32.xlu0 %v3785_v26, %s3564_s27 }
 0x795   :  { %1055 = vrot.lane.b32.xlu1 %v3785_v26, %s3565_s5 }
 0x7fb   :  { %v722_v28 = vpop.permute.xlu1 %721  ;;  %v555_v29 = vpop.permute.xlu0 %554 }
 0x7fc   :  { %3109 = vmatpush3.xpose.msk.msra.mxu0 %vm54_vm0, %v555_v29 }
 0x7fd   :  { %3118 = vmatprep.subr.mxu0 %v3556_v2 }
 0x7ff   :  { %v720_v30 = vpop.permute.xlu1 %719  ;;  %3111 = vmatmul.mubr.msk.f32.vlgmr.msra.gmra.mrb[6].mxu0 %vm54_vm0, %v3785_v26  ;;  %v887_v32 = vpop.permute.xlu0 %886 }
 0x800   :  { %3119 = vmatpush3.xpose.msk.msra.mxu0 %vm54_vm0, %v722_v28  ;;  %3120 = vmatprep.mubr.msk.f32.mxu0 %vm3557_vm1, %v3556_v2 }
 0x801   :  { %3128 = vmatprep.subr.mxu0 %v3556_v2 }
 0x803   :  { %v889_v31 = vpop.permute.xlu1 %888  ;;  %3121 = vmatmul.mubr.msk.f32.vlgmr.msra.gmra.mrb[8].mxu0 %vm54_vm0, %v720_v30  ;;  %v1054_v34 = vpop.permute.xlu0 %1053 }
 0x804   :  { %3129 = vmatpush3.xpose.msk.msra.mxu0 %vm54_vm0, %v889_v31  ;;  %3130 = vmatprep.mubr.msk.f32.mxu0 %vm3557_vm1, %v3556_v2 }
 0x805   :  { %3138 = vmatprep.subr.mxu0 %v3556_v2 }
 0x807   :  { %v1056_v33 = vpop.permute.xlu1 %1055  ;;  %3131 = vmatmul.mubr.msk.f32.vlgmr.msra.gmra.mrb[10].mxu0 %vm54_vm0, %v887_v32 }
 0x808   :  { %3139 = vmatpush3.xpose.msk.msra.mxu0 %vm54_vm0, %v1056_v33  ;;  %3140 = vmatprep.mubr.msk.f32.mxu0 %vm3557_vm1, %v3556_v2  ;;  %v1237_v33 = vld [vmem:[%s4295_s7] sm:$0xff] }
 0x809   :  { %3366 = vmatprep.subr.bf16.mxu0 %v3558_v6 }
 0x80b   :  { %3141 = vmatmul.mubr.msk.f32.vlgmr.msra.gmra.mrb[12].mxu0 %vm54_vm0, %v1054_v34  ;;  %v1238_v34 = vld [vmem:[%s4295_s7 + $0x8] sm:$0xff] }
 0x80c   :  { %3156 = vmatprep.mubr.msk.f32.mxu0 %vm3557_vm1, %v3556_v2  ;;  %v3367_v35 = vpack.c.bf16 %v1238_v34, %v1237_v33  ;;  %v1448_v33 = vld [vmem:[%s4297_s9 + $0x50] sm:$0xff]  ;;  %v1449_v34 = vld [vmem:[%s4297_s9 + $0x58] sm:$0xff] }
 0x80e   :  { %3368 = vmatpush3.bf16.msra.mxu0 %v3367_v35  ;;  %v3394_v35 = vpack.c.bf16 %v1449_v34, %v1448_v33  ;;  %v1527_v33 = vld [vmem:[%s4292_s4 + $0x21] ss:$0 sm:$0xff] }
 0x80f   :  { %3369 = vmatprep.subr.bf16.mxu0 %v3558_v6 }
 0x8d2   :  { %v626_v38 = vpop.f32.mrb[6].mxu0 }
 0x8d3   :  { %v630_v39 = vmul.f32 0.35355338, %v626_v38  ;;  %v3112_v40 = vpop.f32.mrb[7].mxu0  ;;  %v1240_v38 = vld [vmem:[%s4295_s7 + $0x18] sm:$0xff] }
 0x8d5   :  { %v631_v41 = vadd.f32 %v630_v39, %v3823_v37  ;;  %v3370_v39 = vpack.c.bf16 %v1240_v38, %v1239_v36  ;;  %v1450_v36 = vld [vmem:[%s4297_s9 + $0x60] sm:$0xff]  ;;  %v1451_v38 = vld [vmem:[%s4297_s9 + $0x68] sm:$0xff] }
 0x8d6   :  { %v793_v42 = vpop.f32.mrb[8].mxu0 }
 0x8d7   :  { %v797_v43 = vmul.f32 0.35355338, %v793_v42  ;;  %v3122_v44 = vpop.f32.mrb[9].mxu0  ;;  %v632_v45 = vsel %vm54_vm0, %v631_v41, -inf  ;;  %3371 = vmatpush3.bf16.msra.mxu0 %v3370_v39  ;;  %v3397_v39 = vpack.c.bf16 %v1451_v38, %v1450_v36  ;;  %v1548_v36 = vld [vmem:[%s4292_s4 + $0x22] ss:$0 sm:$0xff] }
 0x8d8   :  { %633 = vmax.xlane.f32.xlu1 %v632_v45  ;;  %3378 = vmatprep.subr.bf16.mxu0 %v3558_v6 }
 0x8d9   :  { %v798_v46 = vadd.f32 %v797_v43, %v3823_v37 }
 0x8da   :  { %v960_v47 = vpop.f32.mrb[10].mxu0 }
 0x8db   :  { %v964_v48 = vmul.f32 0.35355338, %v960_v47  ;;  %v3132_v49 = vpop.f32.mrb[11].mxu0  ;;  %v799_v1 = vsel %vm54_vm0, %v798_v46, -inf }
 0x8dc   :  { %800 = vmax.xlane.f32.xlu0 %v799_v1 }
 0x8dd   :  { %v965_v50 = vadd.f32 %v964_v48, %v3823_v37 }
 0x8de   :  { %v1127_v51 = vpop.f32.mrb[12].mxu0 }
 0x8df   :  { %v1131_v52 = vmul.f32 0.35355338, %v1127_v51  ;;  %v3142_v53 = vpop.f32.mrb[13].mxu0  ;;  %v966_v54 = vsel %vm54_vm0, %v965_v50, -inf }
 0x8e0   :  { %967 = vmax.xlane.f32.xlu0 %v966_v54  ;;  %v1241_v53 = vld [vmem:[%s4292_s4 + $0x13] ss:$0 sm:$0xff] }
 0x8e1   :  { %v1132_v55 = vadd.f32 %v1131_v52, %v3823_v37 }
 0x8e3   :  { %v1133_v56 = vsel %vm54_vm0, %v1132_v55, -inf }
 0x8e4   :  { %1134 = vmax.xlane.f32.xlu0 %v1133_v56 }
 0x8e9   :  { %643 = vrot.lane.b32.xlu1 %v3785_v26, %s3566_s28 }
 0x965   :  { %v634_v57 = vpop.xlane.xlu1 %633 }
 0x966   :  { %v635_v58 = vsub.f32 %v631_v41, %v634_v57 }
 0x968   :  { %v636_v59 = vmul.f32 1.442695, %v635_v58 }
 0x969   :  { %v644_v60 = vpop.permute.xlu1 %643  ;;  %v801_v61 = vpop.xlane.xlu0 %800 }
 0x96a   :  { %3482 = vpow2.f32 %v636_v59  ;;  %v802_v62 = vsub.f32 %v798_v46, %v801_v61  ;;  %3114 = vmatpush3.msra.mxu1 %v644_v60 }
 0x96b   :  { %3123 = vmatprep.subr.mxu1 %v3556_v2 }
 0x96c   :  { %v803_v63 = vmul.f32 1.442695, %v802_v62 }
 0x96d   :  { %v968_v0 = vpop.xlane.xlu0 %967 }
 0x96e   :  { %3484 = vpow2.f32 %v803_v63  ;;  %v969_v3 = vsub.f32 %v965_v50, %v968_v0  ;;  %v1333_v0 = vld [vmem:[%s4296_s8] sm:$0xff] }
 0x970   :  { %v970_v4 = vmul.f32 1.442695, %v969_v3  ;;  %v1334_v3 = vld [vmem:[%s4296_s8 + $0x8] sm:$0xff] }
 0x971   :  { %v1135_v5 = vpop.xlane.xlu0 %1134 }
 0x972   :  { %3486 = vpow2.f32 %v970_v4  ;;  %v1136_v7 = vsub.f32 %v1132_v55, %v1135_v5  ;;  %v3373_v4 = vpack.c.bf16 %v1334_v3, %v1333_v0  ;;  %v1336_v5 = vld [vmem:[%s4296_s8 + $0x18] sm:$0xff] }
 0x974   :  { %v3483_v8 = vpop.eup %3482  ;;  %v1137_v9 = vmul.f32 1.442695, %v1136_v7 }
 0x975   :  { %v638_v10 = vsel %vm54_vm0, %v3483_v8, 0.0 }
 0x976   :  { %3488 = vpow2.f32 %v1137_v9  ;;  %639 = vadd.xlane.f32.xlu1 %v638_v10 }
 0x978   :  { %v3485_v11 = vpop.eup %3484 }
 0x979   :  { %v805_v12 = vsel %vm54_vm0, %v3485_v11, 0.0 }
 0x97a   :  { %806 = vadd.xlane.f32.xlu0 %v805_v12  ;;  %v1316_v12 = vld [vmem:[%s4292_s4 + $0x14] ss:$0 sm:$0xff] }
 0x97c   :  { %v3487_v13 = vpop.eup %3486 }
 0x97d   :  { %v972_v14 = vsel %vm54_vm0, %v3487_v13, 0.0 }
 0x97e   :  { %973 = vadd.xlane.f32.xlu1 %v972_v14  ;;  %v1317_v14 = vld [vmem:[%s4292_s4 + $0x15] ss:$0 sm:$0xff] }
 0x980   :  { %v3489_v15 = vpop.eup %3488 }
 0x981   :  { %v1139_v16 = vsel %vm54_vm0, %v3489_v15, 0.0 }
 0x982   :  { %1140 = vadd.xlane.f32.xlu0 %v1139_v16 }
 0x98f   :  { %977 = vrot.lane.b32.xlu1 %v3785_v26, %s3567_s29 }
 0x993   :  { %1144 = vrot.lane.b32.xlu1 %v3785_v26, %s3568_s30 }
 0x998   :  { %810 = vrot.lane.b32.xlu0 %v3785_v26, %s3569_s14 }
 0xa03   :  { %v640_v17 = vpop.xlane.xlu1 %639 }
 0xa04   :  { %3490 = vrcp.f32 %v640_v17  ;;  %v1438_v17 = vld [vmem:[%s4297_s9] sm:$0xff] }
 0xa07   :  { %v807_v18 = vpop.xlane.xlu0 %806 }
 0xa08   :  { %3492 = vrcp.f32 %v807_v18  ;;  %v1439_v18 = vld [vmem:[%s4297_s9 + $0x8] sm:$0xff] }
 0xa0b   :  { %v974_v19 = vpop.xlane.xlu1 %973 }
 0xa0c   :  { %3494 = vrcp.f32 %v974_v19  ;;  %v3379_v19 = vpack.c.bf16 %v1439_v18, %v1438_v17 }
 0xa0e   :  { %v3491_v20 = vpop.eup %3490 }
 0xa0f   :  { %v642_v21 = vmul.f32 %v3491_v20, %v3483_v8  ;;  %v1141_v22 = vpop.xlane.xlu0 %1140  ;;  %v978_v27 = vpop.permute.xlu1 %977  ;;  %v1440_v20 = vld [vmem:[%s4297_s9 + $0x10] sm:$0xff] }
 0xa10   :  { %3496 = vrcp.f32 %v1141_v22 }
 0xa11   :  { %3116 = vmatmul.mubr.msk.f32.vlgmr.msra.gmra.mrb[6].mxu1 %vm54_vm0, %v642_v21  ;;  %v1441_v21 = vld [vmem:[%s4297_s9 + $0x18] sm:$0xff] }
 0xa12   :  { %v3493_v24 = vpop.eup %3492  ;;  %3125 = vmatprep.mubr.msk.f32.mxu1 %vm3557_vm1, %v3556_v2  ;;  %v3382_v22 = vpack.c.bf16 %v1441_v21, %v1440_v20  ;;  %v2850_v21 = vld [vmem:[%s4294_s6 + $0x20] sm:$0xff] }
 0xa13   :  { %v809_v25 = vmul.f32 %v3493_v24, %v3485_v11  ;;  %v811_v28 = vpop.permute.xlu0 %810  ;;  %v1145_v30 = vpop.permute.xlu1 %1144  ;;  %v1442_v24 = vld [vmem:[%s4297_s9 + $0x20] sm:$0xff] }
 0xa14   :  { %3124 = vmatpush3.msra.mxu1 %v811_v28  ;;  %v1444_v28 = vld [vmem:[%s4297_s9 + $0x30] sm:$0xff] }
 0xa15   :  { %3126 = vmatmul.mubr.msk.f32.vlgmr.msra.gmra.mrb[8].mxu1 %vm54_vm0, %v809_v25  ;;  %3133 = vmatprep.subr.mxu1 %v3556_v2  ;;  %v1443_v25 = vld [vmem:[%s4297_s9 + $0x28] sm:$0xff] }
 0xa16   :  { %v3495_v26 = vpop.eup %3494  ;;  %3134 = vmatpush3.msra.mxu1 %v978_v27  ;;  %3135 = vmatprep.mubr.msk.f32.mxu1 %vm3557_vm1, %v3556_v2  ;;  %v3385_v27 = vpack.c.bf16 %v1443_v25, %v1442_v24  ;;  %v2853_v25 = vld [vmem:[%s4294_s6 + $0x38] sm:$0xff] }
 0xa17   :  { %v976_v29 = vmul.f32 %v3495_v26, %v3487_v13  ;;  %3143 = vmatprep.subr.mxu1 %v3556_v2  ;;  %v1445_v26 = vld [vmem:[%s4297_s9 + $0x38] sm:$0xff] }
 0xa19   :  { %3136 = vmatmul.mubr.msk.f32.vlgmr.msra.gmra.mrb[10].mxu1 %vm54_vm0, %v976_v29  ;;  %v3388_v29 = vpack.c.bf16 %v1445_v26, %v1444_v28 }
 0xa1a   :  { %v3497_v31 = vpop.eup %3496  ;;  %3144 = vmatpush3.msra.mxu1 %v1145_v30  ;;  %3145 = vmatprep.mubr.msk.f32.mxu1 %vm3557_vm1, %v3556_v2  ;;  %v1446_v30 = vld [vmem:[%s4297_s9 + $0x40] sm:$0xff] }
 0xa1b   :  { %v1143_v32 = vmul.f32 %v3497_v31, %v3489_v15  ;;  %3372 = vmatprep.subr.bf16.mxu1 %v3558_v6  ;;  %v1447_v31 = vld [vmem:[%s4297_s9 + $0x48] sm:$0xff] }
 0xa1d   :  { %3146 = vmatmul.mubr.msk.f32.vlgmr.msra.gmra.mrb[12].mxu1 %vm54_vm0, %v1143_v32  ;;  %v3391_v32 = vpack.c.bf16 %v1447_v31, %v1446_v30  ;;  %v1526_v31 = vld [vmem:[%s4292_s4 + $0x20] ss:$0 sm:$0xff] }
 0xa1e   :  { %3167 = vmatprep.mubr.msk.f32.mxu1 %vm3557_vm1, %v3556_v2  ;;  %3374 = vmatpush3.bf16.msra.mxu1 %v3373_v4 }
 0xa1f   :  { %3375 = vmatprep.subr.bf16.mxu1 %v3558_v6 }
 0xae4   :  { %v715_v40 = vpop.f32.mrb[6].mxu1 }
 0xae5   :  { %v3117_v41 = vpop.f32.mrb[7].mxu1 }
 0xae6   :  { %v1453_v41 = vld [vmem:[%s4297_s9 + $0x78] sm:$0xff] }
 0xae8   :  { %v882_v42 = vpop.f32.mrb[8].mxu1 }
 0xae9   :  { %1221 = vrot.lane.b32.xlu1 %v882_v42, %s3570_s20  ;;  %v3127_v43 = vpop.f32.mrb[9].mxu1 }
 0xaea   :  { %v1337_v43 = vld [vmem:[%s4292_s4 + $0x16] ss:$0 sm:$0xff] }
 0xaec   :  { %v1049_v44 = vpop.f32.mrb[10].mxu1 }
 0xaed   :  { %1225 = vrot.lane.b32.xlu0 %v1049_v44, %s3571_s21  ;;  %v3137_v45 = vpop.f32.mrb[11].mxu1 }
 0xaf0   :  { %v1216_v46 = vpop.f32.mrb[12].mxu1 }
 0xaf1   :  { %1229 = vrot.lane.b32.xlu1 %v1216_v46, %s3572_s22  ;;  %v3147_v47 = vpop.f32.mrb[13].mxu1 }
 0xb5b   :  { %v1222_v48 = vpop.permute.xlu1 %1221 }
 0xb5c   :  { %v1232_v1 = vsel %vm54_vm0, %v715_v40, %v1222_v48  ;;  %v1452_v40 = vld [vmem:[%s4297_s9 + $0x70] sm:$0xff] }
 0xb5d   :  { %v3400_v42 = vpack.c.bf16 %v1453_v41, %v1452_v40 }
 0xb5f   :  { %v1226_v49 = vpop.permute.xlu0 %1225 }
 0xb60   :  { %v1234_v50 = vsel %vm1233_vm4, %v1232_v1, %v1226_v49 }
 0xb63   :  { %v1230_v51 = vpop.permute.xlu1 %1229 }
 0xb64   :  { %v1236_v52 = vsel %vm1235_vm5, %v1234_v50, %v1230_v51 }
 0xb65   :  { %3157 = vmatmul.mubr.msk.f32.vlgmr.msra.gmra.mrb[14].mxu0 %vm455_vm3, %v1236_v52 }
 0xb66   :  { %3202 = vmatprep.mubr.msk.f32.mxu0 %vm3557_vm1, %v3556_v2  ;;  %3380 = vmatpush3.bf16.msra.mxu0 %v3379_v19 }
 0xb67   :  { %3381 = vmatprep.subr.bf16.mxu0 %v3558_v6 }
 0xb6a   :  { %3383 = vmatpush3.bf16.msra.mxu0 %v3382_v22  ;;  %v2851_v22 = vld [vmem:[%s4294_s6 + $0x28] sm:$0xff] }
 0xb6b   :  { %3384 = vmatprep.subr.bf16.mxu0 %v3558_v6  ;;  %v3403_v24 = vpack.c.bf16 %v2851_v22, %v2850_v21 }
 0xb6e   :  { %3386 = vmatpush3.bf16.msra.mxu0 %v3385_v27 }
 0xb6f   :  { %3387 = vmatprep.subr.bf16.mxu0 %v3558_v6 }
 0xb72   :  { %3389 = vmatpush3.bf16.msra.mxu0 %v3388_v29 }
 0xb73   :  { %3390 = vmatprep.subr.bf16.mxu0 %v3558_v6 }
 0xb76   :  { %3392 = vmatpush3.bf16.msra.mxu0 %v3391_v32 }
 0xb77   :  { %3393 = vmatprep.subr.bf16.mxu0 %v3558_v6 }
 0xb7a   :  { %3395 = vmatpush3.bf16.msra.mxu0 %v3394_v35 }
 0xb7b   :  { %3396 = vmatprep.subr.bf16.mxu0 %v3558_v6 }
 0xb7e   :  { %3398 = vmatpush3.bf16.msra.mxu0 %v3397_v39 }
 0xb7f   :  { %3399 = vmatprep.subr.bf16.mxu0 %v3558_v6 }
 0xb82   :  { %3401 = vmatpush3.bf16.msra.mxu0 %v3400_v42 }
 0xb83   :  { %3246 = vmatprep.subr.mxu0 %v3556_v2 }
 0xc38   :  { %v1311_v54 = vpop.f32.mrb[14].mxu0 }
 0xc39   :  { %v1312_v55 = vadd.f32 %v1311_v54, %v1241_v53  ;;  %v3158_v56 = vpop.f32.mrb[15].mxu0 }
 0xc3b   :  { %v1315_v57 = vadd.f32 %v1312_v55, %v3776_v23  ;;  %v1335_v23 = vld [vmem:[%s4296_s8 + $0x10] sm:$0xff] }
 0xc3c   :  { %v3376_v7 = vpack.c.bf16 %v1336_v5, %v1335_v23 }
 0xc3d   :  { %v1318_v58 = vsel %vm455_vm3, %v1315_v57, 0.0 }
 0xc3e   :  { %1319 = vadd.xlane.f32.xlu0 %v1318_v58  ;;  %3377 = vmatpush3.bf16.msra.mxu1 %v3376_v7 }
 0xc3f   :  { %3402 = vmatprep.subr.bf16.mxu1 %v3558_v6 }
 0xccb   :  { %v1320_v59 = vpop.xlane.xlu0 %1319 }
 0xccc   :  { %v1321_v60 = vmul.f32 0.03125, %v1320_v59 }
 0xcce   :  { %v1322_v61 = vsub.f32 %v1315_v57, %v1321_v60 }
 0xcd0   :  { %v1323_v62 = vmul.f32 %v1322_v61, %v1322_v61 }
 0xcd2   :  { %v1324_v63 = vsel %vm455_vm3, %v1323_v62, 0.0 }
 0xcd3   :  { %1325 = vadd.xlane.f32.xlu1 %v1324_v63 }
 0xd60   :  { %v1326_v8 = vpop.xlane.xlu1 %1325 }
 0xd61   :  { %v1327_v9 = vmul.f32 0.03125, %v1326_v8 }
 0xd63   :  { %v1328_v10 = vadd.f32 1e-05, %v1327_v9  ;;  %v1454_v9 = vld [vmem:[%s4292_s4 + $0x17] ss:$0 sm:$0xff] }
 0xd65   :  { %3498 = vrsqrt.f32 %v1328_v10 }
 0xd6f   :  { %v3499_v11 = vpop.eup %3498 }
 0xd70   :  { %v1330_v13 = vmul.f32 %v3499_v11, %v1322_v61 }
 0xd72   :  { %v1331_v15 = vmul.f32 %v1330_v13, %v1316_v12 }
 0xd74   :  { %v3910_v16 = vadd.f32 %v1331_v15, %v1317_v14 }
 0xd76   :  { %3168 = vmatmul.mubr.msk.f32.vlgmr.msra.gmra.mrb[14].mxu1 %vm455_vm3, %v3910_v16 }
 0xd77   :  { %3213 = vmatprep.mubr.msk.f32.mxu1 %vm3557_vm1, %v3556_v2  ;;  %3404 = vmatpush3.bf16.msra.mxu1 %v3403_v24 }
 0xd78   :  { %3405 = vmatprep.subr.bf16.mxu1 %v3558_v6 }
 0xe49   :  { %v1407_v44 = vpop.f32.mrb[14].mxu1 }
 0xe4a   :  { %v1408_v45 = vadd.f32 %v1407_v44, %v1337_v43  ;;  %v3169_v46 = vpop.f32.mrb[15].mxu1 }
 0xe4c   :  { %v1412_v47 = vmul.f32 0.70710677, %v1408_v45  ;;  %v1411_v5 = vmul.f32 0.5, %v1408_v45 }
 0xe4e   :  { %v1413_v48 = vand.u32 2147483647, %v1412_v47  ;;  %vm1433_vm6 = vcmp.lt.f32.partialorder %v1412_v47, 0.0 }
 0xe50   :  { %v1414_v49 = vmul.f32 0.3275911, %v1413_v48  ;;  %v1427_v50 = vsub.f32 0.0, %v1413_v48 }
 0xe52   :  { %v1415_v1 = vadd.f32 1.0, %v1414_v49  ;;  %v1428_v52 = vmul.f32 %v1427_v50, %v1413_v48 }
 0xe54   :  { %3500 = vrcp.f32 %v1415_v1  ;;  %v1429_v55 = vmul.f32 1.442695, %v1428_v52 }
 0xe56   :  { %3502 = vpow2.f32 %v1429_v55 }
 0xe5e   :  { %v3501_v51 = vpop.eup %3500 }
 0xe5f   :  { %v1418_v53 = vmul.f32 1.0614054, %v3501_v51 }
 0xe60   :  { %v3503_v63 = vpop.eup %3502 }
 0xe61   :  { %v2848_v54 = vadd.f32 -1.4531521, %v1418_v53 }
 0xe63   :  { %v1420_v56 = vmul.f32 %v3501_v51, %v2848_v54 }
 0xe65   :  { %v1421_v57 = vadd.f32 1.4214138, %v1420_v56 }
 0xe67   :  { %v1422_v58 = vmul.f32 %v3501_v51, %v1421_v57 }
 0xe69   :  { %v2849_v59 = vadd.f32 -0.28449672, %v1422_v58 }
 0xe6b   :  { %v1424_v60 = vmul.f32 %v3501_v51, %v2849_v59 }
 0xe6d   :  { %v1425_v61 = vadd.f32 0.2548296, %v1424_v60 }
 0xe6f   :  { %v1426_v62 = vmul.f32 %v3501_v51, %v1425_v61 }
 0xe71   :  { %v1431_v0 = vmul.f32 %v3503_v63, %v1426_v62 }
 0xe73   :  { %v1432_v3 = vsub.f32 1.0, %v1431_v0 }
 0xe75   :  { %v1434_v4 = vsub.f32 0.0, %v1432_v3 }
 0xe77   :  { %v1435_v23 = vsel %vm1433_vm6, %v1434_v4, %v1432_v3 }
 0xe78   :  { %v1436_v7 = vadd.f32 1.0, %v1435_v23 }
 0xe7a   :  { %v1437_v8 = vmul.f32 %v1436_v7, %v1411_v5 }
 0xe7c   :  { %3203 = vmatmul.mubr.f32.vlgmr.msra.gmra.mrb[16].mxu0 %v1437_v8 }
 0xe7d   :  { %3248 = vmatprep.mubr.msk.f32.mxu0 %vm3557_vm1, %v3556_v2 }
 0xf4f   :  { %v1521_v10 = vpop.f32.mrb[16].mxu0 }
 0xf50   :  { %v1522_v11 = vadd.f32 %v1521_v10, %v1454_v9  ;;  %v3204_v12 = vpop.f32.mrb[17].mxu0 }
 0xf52   :  { %v1525_v13 = vadd.f32 %v1522_v11, %v3910_v16  ;;  %v2852_v16 = vld [vmem:[%s4294_s6 + $0x30] sm:$0xff] }
 0xf53   :  { %v3406_v27 = vpack.c.bf16 %v2853_v25, %v2852_v16 }
 0xf54   :  { %v1528_v14 = vsel %vm455_vm3, %v1525_v13, 0.0 }
 0xf55   :  { %1529 = vadd.xlane.f32.xlu0 %v1528_v14  ;;  %3407 = vmatpush3.bf16.msra.mxu1 %v3406_v27 }
 0xf56   :  { %3216 = vmatprep.subr.mxu1 %v3556_v2 }
 0xfe2   :  { %v1530_v15 = vpop.xlane.xlu0 %1529 }
 0xfe3   :  { %v1531_v17 = vmul.f32 0.03125, %v1530_v15 }
 0xfe5   :  { %v1532_v18 = vsub.f32 %v1525_v13, %v1531_v17 }
 0xfe7   :  { %v1533_v19 = vmul.f32 %v1532_v18, %v1532_v18 }
 0xfe9   :  { %v1534_v20 = vsel %vm455_vm3, %v1533_v19, 0.0 }
 0xfea   :  { %1535 = vadd.xlane.f32.xlu0 %v1534_v20 }
0x1077   :  { %v1536_v28 = vpop.xlane.xlu0 %1535 }
0x1078   :  { %v1537_v26 = vmul.f32 0.03125, %v1536_v28 }
0x107a   :  { %v1538_v29 = vadd.f32 1e-05, %v1537_v26 }
0x107c   :  { %3504 = vrsqrt.f32 %v1538_v29 }
0x1086   :  { %v3505_v30 = vpop.eup %3504 }
0x1087   :  { %v1540_v32 = vmul.f32 %v3505_v30, %v1532_v18 }
0x1089   :  { %v1541_v34 = vmul.f32 %v1540_v32, %v1526_v31 }
0x108b   :  { %v4003_v35 = vadd.f32 %v1541_v34, %v1527_v33 }
0x108d   :  { %3214 = vmatmul.mubr.msk.f32.vlgmr.msra.gmra.mrb[16].mxu1 %vm455_vm3, %v4003_v35 }
0x108e   :  { %3218 = vmatprep.mubr.msk.f32.mxu1 %vm3557_vm1, %v3556_v2 }
0x1160   :  { %v1618_v38 = vpop.f32.mrb[16].mxu1 }
0x1161   :  { %v4012_v39 = vadd.f32 %v1618_v38, %v1548_v36  ;;  %v3215_v40 = vpop.f32.mrb[17].mxu1 }
0x1163   :  { %1623 = vrot.lane.b32.xlu0 %v4012_v39, %s3560_s24 }
0x1167   :  { %1790 = vrot.lane.b32.xlu0 %v4012_v39, %s3559_s23 }
0x11d5   :  { %v1624_v41 = vpop.permute.xlu0 %1623 }
0x11d6   :  { %3217 = vmatpush3.xpose.msk.msra.mxu1 %vm54_vm0, %v1624_v41 }
0x11d7   :  { %3221 = vmatprep.subr.mxu1 %v3556_v2 }
0x11d9   :  { %3219 = vmatmul.mubr.msk.f32.vlgmr.msra.gmra.mrb[18].mxu1 %vm54_vm0, %v4012_v39  ;;  %v1791_v55 = vpop.permute.xlu0 %1790 }
0x11da   :  { %3223 = vmatprep.mubr.msk.f32.mxu1 %vm3557_vm1, %v3556_v2 }
0x12ac   :  { %v1695_v42 = vpop.f32.mrb[18].mxu1 }
0x12ad   :  { %v1699_v43 = vmul.f32 0.35355338, %v1695_v42  ;;  %v3220_v44 = vpop.f32.mrb[19].mxu1 }
0x12af   :  { %v1700_v45 = vadd.f32 %v1699_v43, %v3823_v37 }
0x12b1   :  { %v1701_v46 = vsel %vm54_vm0, %v1700_v45, -inf }
0x12b2   :  { %1702 = vmax.xlane.f32.xlu1 %v1701_v46 }
0x12c3   :  { %1712 = vrot.lane.b32.xlu1 %v4012_v39, %s3566_s28 }
0x133f   :  { %v1703_v47 = vpop.xlane.xlu1 %1702 }
0x1340   :  { %v1704_v48 = vsub.f32 %v1700_v45, %v1703_v47 }
0x1342   :  { %v1705_v49 = vmul.f32 1.442695, %v1704_v48  ;;  %v2868_v48 = vld [vmem:[%s4295_s7 + $0x28] sm:$0xff] }
0x1343   :  { %v1713_v1 = vpop.permute.xlu1 %1712 }
0x1344   :  { %3506 = vpow2.f32 %v1705_v49  ;;  %3222 = vmatpush3.msra.mxu1 %v1713_v1  ;;  %v2869_v1 = vld [vmem:[%s4295_s7 + $0x30] sm:$0xff] }
0x1345   :  { %3226 = vmatprep.subr.mxu1 %v3556_v2 }
0x134e   :  { %v3507_v50 = vpop.eup %3506 }
0x134f   :  { %v1707_v51 = vsel %vm54_vm0, %v3507_v50, 0.0 }
0x1350   :  { %1708 = vadd.xlane.f32.xlu1 %v1707_v51 }
0x1361   :  { %1788 = vrot.lane.b32.xlu1 %v4012_v39, %s3561_s25 }
0x1365   :  { %1957 = vrot.lane.b32.xlu1 %v4012_v39, %s3563_s26 }
0x13dd   :  { %v1709_v52 = vpop.xlane.xlu1 %1708 }
0x13de   :  { %3508 = vrcp.f32 %v1709_v52 }
0x13e1   :  { %v1789_v56 = vpop.permute.xlu1 %1788 }
0x13e5   :  { %v1958_v8 = vpop.permute.xlu1 %1957 }
0x13e8   :  { %v3509_v53 = vpop.eup %3508 }
0x13e9   :  { %v1711_v54 = vmul.f32 %v3509_v53, %v3507_v50  ;;  %v2870_v50 = vld [vmem:[%s4295_s7 + $0x38] sm:$0xff] }
0x13ea   :  { %v3412_v51 = vpack.c.bf16 %v2870_v50, %v2869_v1  ;;  %v2406_v50 = vld [vmem:[%s4292_s4 + $0x26] ss:$0 sm:$0xff] }
0x13eb   :  { %3224 = vmatmul.mubr.msk.f32.vlgmr.msra.gmra.mrb[20].mxu1 %vm54_vm0, %v1711_v54 }
0x13ec   :  { %3227 = vmatpush3.xpose.msk.msra.mxu1 %vm54_vm0, %v1791_v55  ;;  %3228 = vmatprep.mubr.msk.f32.mxu1 %vm3557_vm1, %v3556_v2 }
0x13ed   :  { %3231 = vmatprep.subr.mxu1 %v3556_v2 }
0x13ef   :  { %3229 = vmatmul.mubr.msk.f32.vlgmr.msra.gmra.mrb[22].mxu1 %vm54_vm0, %v1789_v56 }
0x13f0   :  { %3233 = vmatprep.mubr.msk.f32.mxu1 %vm3557_vm1, %v3556_v2 }
0x14be   :  { %v4042_v57 = vpop.f32.mrb[20].mxu1 }
0x14bf   :  { %v3225_v58 = vpop.f32.mrb[21].mxu1 }
0x14c2   :  { %v1862_v59 = vpop.f32.mrb[22].mxu1 }
0x14c3   :  { %v1866_v60 = vmul.f32 0.35355338, %v1862_v59  ;;  %v3230_v61 = vpop.f32.mrb[23].mxu1 }
0x14c5   :  { %v1867_v62 = vadd.f32 %v1866_v60, %v3823_v37 }
0x14c7   :  { %v1868_v63 = vsel %vm54_vm0, %v1867_v62, -inf }
0x14c8   :  { %1869 = vmax.xlane.f32.xlu0 %v1868_v63  ;;  %v2309_v63 = vld [vmem:[%s4292_s4 + $0x23] ss:$0 sm:$0xff] }
0x14de   :  { %1879 = vrot.lane.b32.xlu0 %v4012_v39, %s3569_s14 }
0x14e2   :  { %1955 = vrot.lane.b32.xlu0 %v4012_v39, %s3562_s1 }
0x14e6   :  { %2122 = vrot.lane.b32.xlu0 %v4012_v39, %s3564_s27 }
0x1555   :  { %v1870_v0 = vpop.xlane.xlu0 %1869 }
0x1556   :  { %v1871_v3 = vsub.f32 %v1867_v62, %v1870_v0 }
0x1558   :  { %v1872_v4 = vmul.f32 1.442695, %v1871_v3 }
0x1559   :  { %v1880_v23 = vpop.permute.xlu0 %1879 }
0x155a   :  { %3510 = vpow2.f32 %v1872_v4  ;;  %3232 = vmatpush3.msra.mxu1 %v1880_v23 }
0x155b   :  { %3236 = vmatprep.subr.mxu1 %v3556_v2 }
0x155d   :  { %v1956_v10 = vpop.permute.xlu0 %1955 }
0x1561   :  { %v2123_v12 = vpop.permute.xlu0 %2122 }
0x1564   :  { %v3511_v5 = vpop.eup %3510 }
0x1565   :  { %v1874_v7 = vsel %vm54_vm0, %v3511_v5, 0.0 }
0x1566   :  { %1875 = vadd.xlane.f32.xlu1 %v1874_v7 }
0x1577   :  { %2124 = vrot.lane.b32.xlu1 %v4012_v39, %s3565_s5 }
0x15f3   :  { %v1876_v9 = vpop.xlane.xlu1 %1875 }
0x15f4   :  { %3512 = vrcp.f32 %v1876_v9 }
0x15f7   :  { %v2125_v11 = vpop.permute.xlu1 %2124 }
0x15f8   :  { %3247 = vmatpush3.xpose.msk.msra.mxu0 %vm54_vm0, %v2125_v11  ;;  %v2872_v11 = vld [vmem:[%s4296_s8 + $0x20] sm:$0xff] }
0x15f9   :  { %3408 = vmatprep.subr.bf16.mxu0 %v3558_v6 }
0x15fb   :  { %3249 = vmatmul.mubr.msk.f32.vlgmr.msra.gmra.mrb[18].mxu0 %vm54_vm0, %v2123_v12  ;;  %v2873_v12 = vld [vmem:[%s4296_s8 + $0x28] sm:$0xff] }
0x15fc   :  { %3264 = vmatprep.mubr.msk.f32.mxu0 %vm3557_vm1, %v3556_v2 }
0x15fe   :  { %v3513_v13 = vpop.eup %3512 }
0x15ff   :  { %v1878_v14 = vmul.f32 %v3513_v13, %v3511_v5  ;;  %v3415_v13 = vpack.c.bf16 %v2873_v12, %v2872_v11 }
0x1601   :  { %3234 = vmatmul.mubr.msk.f32.vlgmr.msra.gmra.mrb[24].mxu1 %vm54_vm0, %v1878_v14  ;;  %v2875_v14 = vld [vmem:[%s4296_s8 + $0x38] sm:$0xff] }
0x1602   :  { %3237 = vmatpush3.xpose.msk.msra.mxu1 %vm54_vm0, %v1958_v8  ;;  %3238 = vmatprep.mubr.msk.f32.mxu1 %vm3557_vm1, %v3556_v2 }
0x1603   :  { %3241 = vmatprep.subr.mxu1 %v3556_v2 }
0x1605   :  { %3239 = vmatmul.mubr.msk.f32.vlgmr.msra.gmra.mrb[26].mxu1 %vm54_vm0, %v1956_v10 }
0x1606   :  { %3243 = vmatprep.mubr.msk.f32.mxu1 %vm3557_vm1, %v3556_v2 }
0x16ce   :  { %v2196_v15 = vpop.f32.mrb[18].mxu0 }
0x16cf   :  { %v2200_v17 = vmul.f32 0.35355338, %v2196_v15  ;;  %v3250_v18 = vpop.f32.mrb[19].mxu0 }
0x16d1   :  { %v2201_v19 = vadd.f32 %v2200_v17, %v3823_v37 }
0x16d3   :  { %v2202_v20 = vsel %vm54_vm0, %v2201_v19, -inf }
0x16d4   :  { %v1951_v21 = vpop.f32.mrb[24].mxu1  ;;  %2203 = vmax.xlane.f32.xlu0 %v2202_v20 }
0x16d5   :  { %v3235_v22 = vpop.f32.mrb[25].mxu1 }
0x16d8   :  { %v2029_v24 = vpop.f32.mrb[26].mxu1 }
0x16d9   :  { %v2033_v16 = vmul.f32 0.35355338, %v2029_v24  ;;  %v3240_v25 = vpop.f32.mrb[27].mxu1  ;;  %v2385_v24 = vld [vmem:[%s4292_s4 + $0x25] ss:$0 sm:$0xff] }
0x16db   :  { %v2034_v27 = vadd.f32 %v2033_v16, %v3823_v37 }
0x16dd   :  { %v2035_v28 = vsel %vm54_vm0, %v2034_v27, -inf }
0x16de   :  { %2036 = vmax.xlane.f32.xlu1 %v2035_v28  ;;  %v2880_v28 = vld [vmem:[%s4297_s9 + $0x88] sm:$0xff] }
0x16ef   :  { %2046 = vrot.lane.b32.xlu1 %v4012_v39, %s3567_s29 }
0x16f3   :  { %2290 = vrot.lane.b32.xlu1 %v1951_v21, %s3570_s20  ;;  %v2384_v21 = vld [vmem:[%s4292_s4 + $0x24] ss:$0 sm:$0xff] }
0x1761   :  { %v2204_v26 = vpop.xlane.xlu0 %2203 }
0x1762   :  { %v2205_v29 = vsub.f32 %v2201_v19, %v2204_v26 }
0x1764   :  { %v2206_v30 = vmul.f32 1.442695, %v2205_v29  ;;  %v2881_v29 = vld [vmem:[%s4297_s9 + $0x90] sm:$0xff] }
0x1766   :  { %3514 = vpow2.f32 %v2206_v30  ;;  %v2882_v30 = vld [vmem:[%s4297_s9 + $0x98] sm:$0xff] }
0x176b   :  { %v2037_v31 = vpop.xlane.xlu1 %2036 }
0x176c   :  { %v2038_v32 = vsub.f32 %v2034_v27, %v2037_v31  ;;  %v2879_v27 = vld [vmem:[%s4297_s9 + $0x80] sm:$0xff]  ;;  %v3424_v31 = vpack.c.bf16 %v2882_v30, %v2881_v29 }
0x176d   :  { %v3421_v26 = vpack.c.bf16 %v2880_v28, %v2879_v27 }
0x176e   :  { %v2039_v33 = vmul.f32 1.442695, %v2038_v32  ;;  %v2883_v32 = vld [vmem:[%s4297_s9 + $0xa0] sm:$0xff] }
0x176f   :  { %v2047_v34 = vpop.permute.xlu1 %2046 }
0x1770   :  { %v3515_v36 = vpop.eup %3514  ;;  %3516 = vpow2.f32 %v2039_v33  ;;  %3242 = vmatpush3.msra.mxu1 %v2047_v34  ;;  %v2884_v33 = vld [vmem:[%s4297_s9 + $0xa8] sm:$0xff] }
0x1771   :  { %v2208_v37 = vsel %vm54_vm0, %v3515_v36, 0.0  ;;  %3251 = vmatprep.subr.mxu1 %v3556_v2  ;;  %v3427_v34 = vpack.c.bf16 %v2884_v33, %v2883_v32  ;;  %v2596_v33 = vld [vmem:[%s4292_s4 + $0x30] ss:$0 sm:$0xff] }
0x1772   :  { %2209 = vadd.xlane.f32.xlu0 %v2208_v37  ;;  %v2886_v37 = vld [vmem:[%s4297_s9 + $0xb8] sm:$0xff] }
0x1773   :  { %v2291_v56 = vpop.permute.xlu1 %2290 }
0x1774   :  { %v2301_v59 = vsel %vm54_vm0, %v4042_v57, %v2291_v56 }
0x177a   :  { %v3517_v38 = vpop.eup %3516 }
0x177b   :  { %v2041_v40 = vsel %vm54_vm0, %v3517_v38, 0.0 }
0x177c   :  { %2042 = vadd.xlane.f32.xlu0 %v2041_v40  ;;  %v2887_v40 = vld [vmem:[%s4297_s9 + $0xc0] sm:$0xff] }
0x1792   :  { %2213 = vrot.lane.b32.xlu0 %v4012_v39, %s3568_s30  ;;  %v2867_v39 = vld [vmem:[%s4295_s7 + $0x20] sm:$0xff] }
0x1793   :  { %v3409_v49 = vpack.c.bf16 %v2868_v48, %v2867_v39  ;;  %v2893_v48 = vld [vmem:[%s4297_s9 + $0xf0] sm:$0xff] }
0x1795   :  { %3410 = vmatpush3.bf16.msra.mxu0 %v3409_v49  ;;  %v2894_v49 = vld [vmem:[%s4297_s9 + $0xf8] sm:$0xff] }
0x1796   :  { %3411 = vmatprep.subr.bf16.mxu0 %v3558_v6  ;;  %v3442_v1 = vpack.c.bf16 %v2894_v49, %v2893_v48  ;;  %v2633_v48 = vld [vmem:[%s4298_s10 + $0x18] sm:$0xff] }
0x1799   :  { %3413 = vmatpush3.bf16.msra.mxu0 %v3412_v51 }
0x179a   :  { %3420 = vmatprep.subr.bf16.mxu0 %v3558_v6 }
0x17ff   :  { %v2210_v41 = vpop.xlane.xlu0 %2209 }
0x1809   :  { %v2043_v42 = vpop.xlane.xlu0 %2042 }
0x180a   :  { %3518 = vrcp.f32 %v2043_v42 }
0x180b   :  { %3520 = vrcp.f32 %v2210_v41  ;;  %v2888_v41 = vld [vmem:[%s4297_s9 + $0xc8] sm:$0xff] }
0x180c   :  { %v3433_v42 = vpack.c.bf16 %v2888_v41, %v2887_v40 }
0x180d   :  { %v2214_v46 = vpop.permute.xlu0 %2213 }
0x1814   :  { %v3519_v43 = vpop.eup %3518 }
0x1815   :  { %v2045_v44 = vmul.f32 %v3519_v43, %v3517_v38  ;;  %v3521_v45 = vpop.eup %3520  ;;  %v2889_v43 = vld [vmem:[%s4297_s9 + $0xd0] sm:$0xff] }
0x1816   :  { %v2212_v47 = vmul.f32 %v3521_v45, %v3515_v36  ;;  %v2885_v36 = vld [vmem:[%s4297_s9 + $0xb0] sm:$0xff] }
0x1817   :  { %3244 = vmatmul.mubr.msk.f32.vlgmr.msra.gmra.mrb[28].mxu1 %vm54_vm0, %v2045_v44  ;;  %v3430_v38 = vpack.c.bf16 %v2886_v37, %v2885_v36  ;;  %v2890_v44 = vld [vmem:[%s4297_s9 + $0xd8] sm:$0xff] }
0x1818   :  { %3252 = vmatpush3.msra.mxu1 %v2214_v46  ;;  %3253 = vmatprep.mubr.msk.f32.mxu1 %vm3557_vm1, %v3556_v2  ;;  %v3436_v45 = vpack.c.bf16 %v2890_v44, %v2889_v43  ;;  %v2891_v46 = vld [vmem:[%s4297_s9 + $0xe0] sm:$0xff] }
0x1819   :  { %3414 = vmatprep.subr.bf16.mxu1 %v3558_v6 }
0x181b   :  { %3254 = vmatmul.mubr.msk.f32.vlgmr.msra.gmra.mrb[30].mxu1 %vm54_vm0, %v2212_v47  ;;  %v2892_v47 = vld [vmem:[%s4297_s9 + $0xe8] sm:$0xff] }
0x181c   :  { %3275 = vmatprep.mubr.msk.f32.mxu1 %vm3557_vm1, %v3556_v2  ;;  %3416 = vmatpush3.bf16.msra.mxu1 %v3415_v13  ;;  %v3439_v39 = vpack.c.bf16 %v2892_v47, %v2891_v46  ;;  %v2631_v46 = vld [vmem:[%s4298_s10 + $0x8] sm:$0xff] }
0x181d   :  { %3417 = vmatprep.subr.bf16.mxu1 %v3558_v6 }
0x18ea   :  { %v2118_v52 = vpop.f32.mrb[28].mxu1 }
0x18eb   :  { %2294 = vrot.lane.b32.xlu1 %v2118_v52, %s3571_s21  ;;  %v3245_v53 = vpop.f32.mrb[29].mxu1 }
0x18ee   :  { %v2285_v54 = vpop.f32.mrb[30].mxu1 }
0x18ef   :  { %2298 = vrot.lane.b32.xlu1 %v2285_v54, %s3572_s22  ;;  %v3255_v55 = vpop.f32.mrb[31].mxu1 }
0x195d   :  { %v2295_v58 = vpop.permute.xlu1 %2294 }
0x195e   :  { %v2302_v60 = vsel %vm1233_vm4, %v2301_v59, %v2295_v58 }
0x1961   :  { %v2299_v61 = vpop.permute.xlu1 %2298 }
0x1962   :  { %v2303_v62 = vsel %vm1235_vm5, %v2302_v60, %v2299_v61 }
0x1963   :  { %3265 = vmatmul.mubr.msk.f32.vlgmr.msra.gmra.mrb[20].mxu0 %vm455_vm3, %v2303_v62 }
0x1964   :  { %3310 = vmatprep.mubr.msk.f32.mxu0 %vm3557_vm1, %v3556_v2  ;;  %3422 = vmatpush3.bf16.msra.mxu0 %v3421_v26 }
0x1965   :  { %3423 = vmatprep.subr.bf16.mxu0 %v3558_v6 }
0x1968   :  { %3425 = vmatpush3.bf16.msra.mxu0 %v3424_v31 }
0x1969   :  { %3426 = vmatprep.subr.bf16.mxu0 %v3558_v6 }
0x196c   :  { %3428 = vmatpush3.bf16.msra.mxu0 %v3427_v34  ;;  %v2597_v34 = vld [vmem:[%s4292_s4 + $0x31] ss:$0 sm:$0xff] }
0x196d   :  { %3429 = vmatprep.subr.bf16.mxu0 %v3558_v6 }
0x1970   :  { %3431 = vmatpush3.bf16.msra.mxu0 %v3430_v38 }
0x1971   :  { %3432 = vmatprep.subr.bf16.mxu0 %v3558_v6 }
0x1974   :  { %3434 = vmatpush3.bf16.msra.mxu0 %v3433_v42 }
0x1975   :  { %3435 = vmatprep.subr.bf16.mxu0 %v3558_v6 }
0x1978   :  { %3437 = vmatpush3.bf16.msra.mxu0 %v3436_v45  ;;  %v2630_v45 = vld [vmem:[%s4298_s10] sm:$0xff] }
0x1979   :  { %3438 = vmatprep.subr.bf16.mxu0 %v3558_v6  ;;  %v3445_v47 = vpack.c.bf16 %v2631_v46, %v2630_v45 }
0x197c   :  { %3440 = vmatpush3.bf16.msra.mxu0 %v3439_v39  ;;  %v2632_v39 = vld [vmem:[%s4298_s10 + $0x10] sm:$0xff] }
0x197d   :  { %3441 = vmatprep.subr.bf16.mxu0 %v3558_v6  ;;  %v3448_v49 = vpack.c.bf16 %v2633_v48, %v2632_v39 }
0x1980   :  { %3443 = vmatpush3.bf16.msra.mxu0 %v3442_v1 }
0x1a36   :  { %v2379_v0 = vpop.f32.mrb[20].mxu0 }
0x1a37   :  { %v2380_v3 = vadd.f32 %v2379_v0, %v2309_v63  ;;  %v3266_v4 = vpop.f32.mrb[21].mxu0 }
0x1a39   :  { %v2383_v23 = vadd.f32 %v2380_v3, %v4003_v35  ;;  %v2874_v35 = vld [vmem:[%s4296_s8 + $0x30] sm:$0xff] }
0x1a3a   :  { %v3418_v15 = vpack.c.bf16 %v2875_v14, %v2874_v35 }
0x1a3b   :  { %v2386_v57 = vsel %vm455_vm3, %v2383_v23, 0.0 }
0x1a3c   :  { %2387 = vadd.xlane.f32.xlu0 %v2386_v57  ;;  %3419 = vmatpush3.bf16.msra.mxu1 %v3418_v15 }
0x1a3d   :  { %3444 = vmatprep.subr.bf16.mxu1 %v3558_v6 }
0x1ac9   :  { %v2388_v5 = vpop.xlane.xlu0 %2387 }
0x1aca   :  { %v2389_v7 = vmul.f32 0.03125, %v2388_v5 }
0x1acc   :  { %v2390_v8 = vsub.f32 %v2383_v23, %v2389_v7 }
0x1ace   :  { %v2391_v9 = vmul.f32 %v2390_v8, %v2390_v8 }
0x1ad0   :  { %v2392_v10 = vsel %vm455_vm3, %v2391_v9, 0.0 }
0x1ad1   :  { %2393 = vadd.xlane.f32.xlu1 %v2392_v10 }
0x1b5e   :  { %v2394_v17 = vpop.xlane.xlu1 %2393 }
0x1b5f   :  { %v2395_v18 = vmul.f32 0.03125, %v2394_v17  ;;  %v2524_v17 = vld [vmem:[%s4292_s4 + $0x27] ss:$0 sm:$0xff] }
0x1b61   :  { %v2396_v19 = vadd.f32 1e-05, %v2395_v18 }
0x1b63   :  { %3522 = vrsqrt.f32 %v2396_v19 }
0x1b6d   :  { %v3523_v20 = vpop.eup %3522 }
0x1b6e   :  { %v2398_v22 = vmul.f32 %v3523_v20, %v2390_v8 }
0x1b70   :  { %v2399_v16 = vmul.f32 %v2398_v22, %v2384_v21 }
0x1b72   :  { %v4137_v25 = vadd.f32 %v2399_v16, %v2385_v24 }
0x1b74   :  { %3276 = vmatmul.mubr.msk.f32.vlgmr.msra.gmra.mrb[32].mxu1 %vm455_vm3, %v4137_v25 }
0x1b75   :  { %3321 = vmatprep.mubr.msk.f32.mxu1 %vm3557_vm1, %v3556_v2  ;;  %3446 = vmatpush3.bf16.msra.mxu1 %v3445_v47 }
0x1b76   :  { %3447 = vmatprep.subr.bf16.mxu1 %v3558_v6 }
0x1b79   :  { %3449 = vmatpush3.bf16.msra.mxu1 %v3448_v49 }
0x1c47   :  { %v2476_v51 = vpop.f32.mrb[32].mxu1 }
0x1c48   :  { %v2477_v52 = vadd.f32 %v2476_v51, %v2406_v50  ;;  %v3277_v53 = vpop.f32.mrb[33].mxu1 }
0x1c49   :  { %v2613_v53 = vld [vmem:[%s4292_s4 + $0x6] ss:$0 sm:$0xff] }
0x1c4a   :  { %v2481_v54 = vmul.f32 0.70710677, %v2477_v52  ;;  %v2480_v35 = vmul.f32 0.5, %v2477_v52 }
0x1c4c   :  { %v2482_v55 = vand.u32 2147483647, %v2481_v54  ;;  %vm2502_vm7 = vcmp.lt.f32.partialorder %v2481_v54, 0.0  ;;  %v2614_v54 = vld [vmem:[%s4292_s4 + $0x7] ss:$0 sm:$0xff] }
0x1c4e   :  { %v2483_v56 = vmul.f32 0.3275911, %v2482_v55  ;;  %v2496_v59 = vsub.f32 0.0, %v2482_v55 }
0x1c50   :  { %v2484_v58 = vadd.f32 1.0, %v2483_v56  ;;  %v2497_v61 = vmul.f32 %v2496_v59, %v2482_v55  ;;  %v2713_v59 = vld [vmem:[%s4299_s11 + $0x18] sm:$0xff] }
0x1c52   :  { %3524 = vrcp.f32 %v2484_v58  ;;  %v2498_v0 = vmul.f32 1.442695, %v2497_v61  ;;  %v2711_v58 = vld [vmem:[%s4299_s11 + $0x8] sm:$0xff] }
0x1c53   :  { %v3450_v61 = vpack.c.bf16 %v2713_v59, %v2711_v58 }
0x1c54   :  { %3526 = vpow2.f32 %v2498_v0 }
0x1c55   :  { %3451 = vmatprep.subr.bf16.mxu1 %v3450_v61 }
0x1c5c   :  { %v3525_v60 = vpop.eup %3524 }
0x1c5d   :  { %v2487_v62 = vmul.f32 1.0614054, %v3525_v60 }
0x1c5e   :  { %v3527_v9 = vpop.eup %3526 }
0x1c5f   :  { %v2877_v63 = vadd.f32 -1.4531521, %v2487_v62  ;;  %v2712_v62 = vld [vmem:[%s4299_s11 + $0x10] sm:$0xff] }
0x1c61   :  { %v2489_v3 = vmul.f32 %v3525_v60, %v2877_v63  ;;  %v2717_v63 = vld [vmem:[%s4299_s11 + $0x38] sm:$0xff] }
0x1c63   :  { %v2490_v4 = vadd.f32 1.4214138, %v2489_v3 }
0x1c65   :  { %v2491_v23 = vmul.f32 %v3525_v60, %v2490_v4  ;;  %v2714_v4 = vld [vmem:[%s4299_s11 + $0x20] sm:$0xff] }
0x1c67   :  { %v2878_v57 = vadd.f32 -0.28449672, %v2491_v23  ;;  %v2716_v23 = vld [vmem:[%s4299_s11 + $0x30] sm:$0xff] }
0x1c69   :  { %v2493_v5 = vmul.f32 %v3525_v60, %v2878_v57  ;;  %v3456_v57 = vpack.c.bf16 %v2716_v23, %v2714_v4 }
0x1c6b   :  { %v2494_v7 = vadd.f32 0.2548296, %v2493_v5  ;;  %v2634_v5 = vld [vmem:[%s4292_s4 + $0x10] ss:$0 sm:$0xff] }
0x1c6d   :  { %v2495_v8 = vmul.f32 %v3525_v60, %v2494_v7  ;;  %v2710_v60 = vld [vmem:[%s4299_s11] sm:$0xff] }
0x1c6e   :  { %v3452_v0 = vpack.c.bf16 %v2712_v62, %v2710_v60 }
0x1c6f   :  { %v2500_v10 = vmul.f32 %v3527_v9, %v2495_v8 }
0x1c71   :  { %v2501_v11 = vsub.f32 1.0, %v2500_v10 }
0x1c73   :  { %v2503_v12 = vsub.f32 0.0, %v2501_v11 }
0x1c75   :  { %v2504_v13 = vsel %vm2502_vm7, %v2503_v12, %v2501_v11 }
0x1c76   :  { %v2505_v14 = vadd.f32 1.0, %v2504_v13 }
0x1c78   :  { %v2506_v15 = vmul.f32 %v2505_v14, %v2480_v35 }
0x1c7a   :  { %3311 = vmatmul.mubr.f32.vlgmr.msra.gmra.mrb[22].mxu0 %v2506_v15 }
0x1d4d   :  { %v2591_v18 = vpop.f32.mrb[22].mxu0 }
0x1d4e   :  { %v2592_v19 = vadd.f32 %v2591_v18, %v2524_v17  ;;  %v3312_v20 = vpop.f32.mrb[23].mxu0 }
0x1d50   :  { %v2595_v21 = vadd.f32 %v2592_v19, %v4137_v25 }
0x1d52   :  { %v2598_v22 = vsel %vm455_vm3, %v2595_v21, 0.0 }
0x1d53   :  { %2599 = vadd.xlane.f32.xlu0 %v2598_v22 }
0x1de0   :  { %v2600_v24 = vpop.xlane.xlu0 %2599 }
0x1de1   :  { %v2601_v16 = vmul.f32 0.03125, %v2600_v24 }
0x1de3   :  { %v2602_v27 = vsub.f32 %v2595_v21, %v2601_v16 }
0x1de5   :  { %v2603_v28 = vmul.f32 %v2602_v27, %v2602_v27 }
0x1de7   :  { %v2604_v26 = vsel %vm455_vm3, %v2603_v28, 0.0 }
0x1de8   :  { %2605 = vadd.xlane.f32.xlu0 %v2604_v26 }
0x1e75   :  { %v2606_v29 = vpop.xlane.xlu0 %2605 }
0x1e76   :  { %v2607_v30 = vmul.f32 0.03125, %v2606_v29 }
0x1e78   :  { %v2608_v31 = vadd.f32 1e-05, %v2607_v30 }
0x1e7a   :  { %3528 = vrsqrt.f32 %v2608_v31 }
0x1e84   :  { %v3529_v32 = vpop.eup %3528 }
0x1e85   :  { %v2610_v25 = vmul.f32 %v3529_v32, %v2602_v27 }
0x1e87   :  { %v2611_v36 = vmul.f32 %v2610_v25, %v2596_v33 }
0x1e89   :  { %v2612_v37 = vadd.f32 %v2611_v36, %v2597_v34 }
0x1e8b   :  { %v2615_v38 = vsel %vm455_vm3, %v2612_v37, 0.0 }
0x1e8c   :  { %2616 = vadd.xlane.f32.xlu0 %v2615_v38 }
0x1f19   :  { %v2617_v40 = vpop.xlane.xlu0 %2616 }
0x1f1a   :  { %v2618_v41 = vmul.f32 0.03125, %v2617_v40 }
0x1f1c   :  { %v2619_v42 = vsub.f32 %v2612_v37, %v2618_v41 }
0x1f1e   :  { %v2620_v43 = vmul.f32 %v2619_v42, %v2619_v42 }
0x1f20   :  { %v2621_v44 = vsel %vm455_vm3, %v2620_v43, 0.0 }
0x1f21   :  { %2622 = vadd.xlane.f32.xlu1 %v2621_v44 }
0x1fae   :  { %v2623_v1 = vpop.xlane.xlu1 %2622 }
0x1faf   :  { %v2624_v50 = vmul.f32 0.03125, %v2623_v1 }
0x1fb1   :  { %v2625_v51 = vadd.f32 1e-05, %v2624_v50 }
0x1fb3   :  { %3530 = vrsqrt.f32 %v2625_v51 }
0x1fbd   :  { %v3531_v52 = vpop.eup %3530 }
0x1fbe   :  { %v2627_v6 = vmul.f32 %v3531_v52, %v2619_v42 }
0x1fc0   :  { %v2628_v55 = vmul.f32 %v2627_v6, %v2613_v53 }
0x1fc2   :  { %v2629_v56 = vadd.f32 %v2628_v55, %v2614_v54 }
0x1fc4   :  { %3322 = vmatmul.mubr.msk.f32.vlgmr.msra.gmra.mrb[34].mxu1 %vm455_vm3, %v2629_v56 }
0x1fc5   :  { %2800 = vmatprep.mubr.f32.mxu1 %v3556_v2  ;;  %v2715_v2 = vld [vmem:[%s4299_s11 + $0x28] sm:$0xff]  ;;  %3453 = vmatpush1.bf16.msra.mxu1 %v3452_v0  ;;  %s3573_s11 = smov [#allocation2]  }
0x1fc6   :  { %v3454_v3 = vpack.c.bf16 %v2717_v63, %v2715_v2  ;;  %s2815_s0 = sshll.u32 %s3573_s11, 4  ;;  %s2816_s0 = int_to_ptr.vmem [resolvable:$true] %s2815_s0 }
0x1fc7   :  { %s3532_s16 = scalar_lea.vmem %s2816_s0, 128  ;;  %p3537_p1 = scmp.lt.s32.totalorder %s2816_s0, %s2816_s0 }
0x1fc8   :  { %3455 = vmatprep.subr.bf16.mxu1 %v3454_v3  ;;  %p3533_p0 = scmp.ne.s32.totalorder %s2816_s0, %s3532_s16  ;;  %p3538_p2 = scmp.lt.s32.totalorder %s3532_s16, %s3532_s16 }
0x1fc9   :  { %3457 = vmatpush1.bf16.msra.mxu1 %v3456_v57 }
0x1fca   :  { %p3539_p3 = por %p3538_p2, %p3537_p1 }
0x1fcc   :  { %p3540_p4 = pnand %p3539_p3, %p3533_p0 }
0x2097   :  { %v2704_v7 = vpop.f32.mrb[34].mxu1 }
0x2098   :  { %v2705_v8 = vadd.f32 %v2704_v7, %v2634_v5  ;;  %v3323_v9 = vpop.f32.mrb[35].mxu1 }
0x209a   :  { %v2709_v10 = vmax.f32 %v2705_v8, 0.0  ;;  %2708 = vst.msk [vmem:[#allocation2] sm:$0xff] %vm128_vm2, %v2705_v8 }
0x209c   :  { %2732 = vrot.lane.b32.xlu0 %v2709_v10, %s3566_s28 }
0x210e   :  { %v2733_v11 = vpop.permute.xlu0 %2732 }
0x210f   :  { %2897 = vmatmul.mubr.msk.f32.vlgmr.msra.gmra.mrb[36].mxu1 %vm455_vm3, %v2733_v11 }
0x2110   :  { %3543 = shalt.err (!%p3540_p4)
}
0x2111   :  { %s3544_s6 = scalar_lea.hbm %s4300_s12, 128 }
0x2112   :  { %p3545_p5 = scmp.ne.s32.totalorder %s4300_s12, %s3544_s6  ;;  %p3548_p6 = scmp.lt.u32.totalorder %s3544_s6, %s4300_s12 }
0x2114   :  { %p3550_p7 = pnand %p3548_p6, %p3545_p5 }
0x2116   :  { %3553 = shalt.err (!%p3550_p7)
}
0x2117   :  { %2818 = dma.vmem_to_hbm [thread:$0]  %s2816_s0, 128, %s4300_s12, [#allocation3]   ;;  %v2721_v12 = vlaneseq  ;;  %v2896_v14 = vld [vmem:[%s4292_s4 + $0x11] ss:$8 sm:$0x3] }
0x2119   :  { %v2722_v13 = vshrl.u32 %v2721_v12, 7 }
0x211b   :  { %v2723_v35 = vsub.s32 0, %v2722_v13  ;;  %v2727_v15 = vsub.s32 1, %v2722_v13 }
0x211d   :  { %v2724_v17 = vrot.slane %v2896_v14, %v2723_v35  ;;  %v2728_v18 = vrot.slane %v2896_v14, %v2727_v15 }
0x21e2   :  { %v2802_v19 = vpop.f32.mrb[36].mxu1 }
0x21e3   :  { %v2803_v20 = vadd.f32 %v2802_v19, %v2724_v17  ;;  %v2804_v21 = vpop.f32.mrb[37].mxu1 }
0x21e4   :  { %v2805_v22 = vadd.f32 %v2804_v21, %v2728_v18 }
0x21e5   :  { %2807 = vst [vmem:[%s4301_s13] sm:$0xff] %v2803_v20 }
0x21e6   :  { %2808 = vst.msk [vmem:[%s4301_s13 + $0x8] sm:$0xff] %vm455_vm3, %v2805_v22 }
0x21e7   :  { %3554 = dma.done.wait [#allocation3], 128  }
0x21e8   :  { %3555 = vsyncadd [#allocation3], 4294967168 }
0x21e9   :  { %2826 = vsyncpa [#allocation3], 1 }

</bundles_post_ra>
